<compile_context>
chip_gen: v7x
topology: tpu7x:2x2x1
jax: 0.10.0
libtpu: 0.0.40
codegen_flags: <defaults>
</compile_context>

<pallas_src>
import jax
import jax.numpy as jnp
from jax.experimental import pallas as pl
from jax.experimental.pallas import tpu as pltpu


def _make_lstm_chunk_kernel(seq_len, padded_len):
    """Builds the per-chunk kernel; seq_len/padded_len are static Python ints."""

    def kernel(x_ref, wih_ref, bias_ref, whh_ref, out_ref, hn_ref, cn_ref, gin_ref):
        # x_ref   : (Bb, Tc, I)   input chunk (batch-first)
        # wih_ref : (I, 4H)       W_ih^T, VMEM-resident (constant index_map)
        # bias_ref: (1, 4H)       b_ih + b_hh, VMEM-resident
        # whh_ref : (H, 4H)       W_hh^T, VMEM-resident
        # out_ref : (Bb, Tc, H)   hidden states for this chunk (batch-first)
        # hn_ref  : (Bb, H)       running h state (constant over chunk axis -> resident)
        # cn_ref  : (Bb, H)       running c state (resident)
        # gin_ref : (Bb, Tc, 4H)  VMEM scratch: this chunk's gate pre-activations
        Bb, Tc, I = x_ref.shape
        H = hn_ref.shape[-1]
        H4 = 4 * H

        @pl.when(pl.program_id(1) == 0)
        def _():
            hn_ref[...] = jnp.zeros_like(hn_ref)
            cn_ref[...] = jnp.zeros_like(cn_ref)

        # ---- Fused input projection for the whole chunk (off the serial path). ----
        # Tc is always a multiple of 8, so these reshapes are free layout views.
        x2d = x_ref[...].reshape(Bb * Tc, I)
        gin = jnp.dot(x2d, wih_ref[...], preferred_element_type=jnp.float32)
        gin_ref[...] = (gin + bias_ref[...]).reshape(Bb, Tc, H4)

        # Recurrent weight in bf16 (native MXU rate); cast once per chunk.
        whh = whh_ref[...].astype(jnp.bfloat16)

        # Lane constants for the single-tanh activation trick (hoisted out of the loop):
        #   sigmoid(x) = 0.5*tanh(0.5*x) + 0.5 on the i/f/o lanes, tanh(x) on g lanes.
        lane = jax.lax.broadcasted_iota(jnp.int32, (Bb, H4), 1)
        is_g = (lane >= 2 * H) & (lane < 3 * H)
        pre = jnp.where(is_g, 1.0, 0.5).astype(jnp.float32)   # also the post-multiplier
        post = jnp.where(is_g, 0.0, 0.5).astype(jnp.float32)

        h = hn_ref[...]
        c = cn_ref[...]
        t0 = pl.program_id(1) * Tc
        # Number of valid steps in the LAST chunk; steps with t >= last_valid can only
        # ever be zero-padding, so masking code is emitted statically only for those.
        last_valid = seq_len - (padded_len - Tc)

        # Bounded static unroll (Tc <= 32) == fori_loop(..., unroll=True): full LLO
        # visibility, static slices; only h @ W_hh^T remains on the serial path.
        for t in range(Tc):
            gates = gin_ref[:, t, :] + jnp.dot(
                h.astype(jnp.bfloat16), whh, preferred_element_type=jnp.float32)
            act = jnp.tanh(gates * pre) * pre + post           # single EUP pass
            i_g = act[:, 0:H]
            f_g = act[:, H:2 * H]
            g_g = act[:, 2 * H:3 * H]
            o_g = act[:, 3 * H:4 * H]
            c_new = f_g * c + i_g * g_g
            h_new = o_g * jnp.tanh(c_new)
            if t >= last_valid:
                # Zero-padded tail steps must not advance the recurrence.
                valid = (t0 + t) < seq_len
                c = jnp.where(valid, c_new, c)
                h = jnp.where(valid, h_new, h)
            else:
                c, h = c_new, h_new
            out_ref[:, t, :] = h.astype(out_ref.dtype)

        hn_ref[...] = h
        cn_ref[...] = c

    return kernel


def _plan(batch_blk, seq_len, input_size, hidden):
    """Pick (padded_len, Tc, vmem_limit_bytes) under a VMEM budget (static ints)."""
    h4 = 4 * hidden
    padded8 = -(-seq_len // 8) * 8            # round up to a multiple of 8 (sublanes)

    def est_bytes(tc):
        f32 = 4
        return f32 * (
            2 * batch_blk * tc * input_size   # x block (double-buffered)
            + 2 * batch_blk * tc * hidden     # out block (double-buffered)
            + batch_blk * tc * h4             # gin scratch
            + 2 * input_size * h4             # W_ih^T
            + 2 * hidden * h4                 # W_hh^T
            + 2 * h4                          # bias
            + 4 * batch_blk * hidden)         # h/c state blocks

    budget = 40 * 2 ** 20                     # leave headroom even on v7x (64 MiB VMEM)
    tc = 8
    for cand in (32, 16, 8):
        if padded8 % cand == 0 and est_bytes(cand) <= budget:
            tc = cand
            break
    vmem_limit = int(min(48 * 2 ** 20, max(32 * 2 ** 20, 2 * est_bytes(tc))))
    return padded8, tc, vmem_limit


@jax.jit
def single_lstm_forward(x, w_ih, w_hh, b_ih, b_hh):
    """Equivalent of singleLSTM.forward: returns (output, h_n[-1], c_n[-1]).

    x:    (B, T, I)  batch_first, like PyTorch
    w_ih: (4H, I), w_hh: (4H, H), b_ih/b_hh: (4H,)  -- PyTorch parameter layout
    """
    B, T, I = x.shape
    H4 = w_ih.shape[0]
    H = H4 // 4

    x = x.astype(jnp.float32)
    wih_t = jnp.transpose(w_ih).astype(jnp.float32)            # (I, 4H)
    whh_t = jnp.transpose(w_hh).astype(jnp.float32)            # (H, 4H)
    bias = (b_ih + b_hh).astype(jnp.float32).reshape(1, H4)    # folded bias

    # Megacore (v7x): split batch across TensorCores only when each core still gets
    # >= 8 sublane rows (keeps the (8,128) block rule for the 2-D h/c state blocks).
    n_b = 2 if (B % 16 == 0) else 1
    B_blk = B // n_b

    T_pad, Tc, vmem_limit = _plan(B_blk, T, I, H)
    if T_pad != T:
        x = jnp.pad(x, ((0, 0), (0, T_pad - T), (0, 0)))
    n_chunks = T_pad // Tc

    kernel = _make_lstm_chunk_kernel(T, T_pad)

    out, h_n, c_n = pl.pallas_call(
        kernel,
        out_shape=(
            jax.ShapeDtypeStruct((B, T_pad, H), jnp.float32),   # output (batch-first)
            jax.ShapeDtypeStruct((B, H), jnp.float32),          # h_n[-1]
            jax.ShapeDtypeStruct((B, H), jnp.float32),          # c_n[-1]
        ),
        grid_spec=pltpu.PrefetchScalarGridSpec(
            num_scalar_prefetch=0,
            grid=(n_b, n_chunks),
            in_specs=[
                pl.BlockSpec((B_blk, Tc, I), lambda b, c: (b, c, 0)),   # x chunk
                pl.BlockSpec((I, H4), lambda b, c: (0, 0)),             # W_ih^T (resident)
                pl.BlockSpec((1, H4), lambda b, c: (0, 0)),             # bias   (resident)
                pl.BlockSpec((H, H4), lambda b, c: (0, 0)),             # W_hh^T (resident)
            ],
            out_specs=[
                pl.BlockSpec((B_blk, Tc, H), lambda b, c: (b, c, 0)),   # per-chunk output
                pl.BlockSpec((B_blk, H), lambda b, c: (b, 0)),          # running h state
                pl.BlockSpec((B_blk, H), lambda b, c: (b, 0)),          # running c state
            ],
            scratch_shapes=[pltpu.VMEM((B_blk, Tc, H4), jnp.float32)],  # chunk gate pre-acts
        ),
        compiler_params=pltpu.CompilerParams(
            dimension_semantics=("parallel", "arbitrary"),
            vmem_limit_bytes=vmem_limit,
        ),
    )(x, wih_t, bias, whh_t)

    if T_pad != T:
        out = out[:, :T, :]
    return out, h_n, c_n


def _reference_lstm(x, w_ih, w_hh, b_ih, b_hh):
    """Pure-JAX f32 reference (PyTorch nn.LSTM semantics, single layer, batch_first)."""
    B, T, I = x.shape
    H = w_hh.shape[1]
    bias = (b_ih + b_hh)[None, :]

    def step(carry, x_t):
        h, c = carry
        gates = x_t @ w_ih.T + h @ w_hh.T + bias
        i = jax.nn.sigmoid(gates[:, 0:H])
        f = jax.nn.sigmoid(gates[:, H:2 * H])
        g = jnp.tanh(gates[:, 2 * H:3 * H])
        o = jax.nn.sigmoid(gates[:, 3 * H:4 * H])
        c = f * c + i * g
        h = o * jnp.tanh(c)
        return (h, c), h

    init = (jnp.zeros((B, H), jnp.float32), jnp.zeros((B, H), jnp.float32))
    (h_n, c_n), hs = jax.lax.scan(step, init, jnp.transpose(x, (1, 0, 2)))
    return jnp.transpose(hs, (1, 0, 2)), h_n, c_n


if __name__ == "__main__":
    B, T, INPUT_SIZE, HIDDEN = 2, 8, 4, 32

    key = jax.random.PRNGKey(0)
    k1, k2, k3, k4, k5, kx = jax.random.split(key, 6)
    bound = 1.0 / (HIDDEN ** 0.5)   # PyTorch nn.LSTM init: U(-1/sqrt(H), 1/sqrt(H))

    w_ih = jax.random.uniform(k1, (4 * HIDDEN, INPUT_SIZE), jnp.float32, -bound, bound)
    w_hh = jax.random.uniform(k2, (4 * HIDDEN, HIDDEN), jnp.float32, -bound, bound)
    b_ih = jax.random.uniform(k3, (4 * HIDDEN,), jnp.float32, -bound, bound)
    b_hh = jax.random.uniform(k4, (4 * HIDDEN,), jnp.float32, -bound, bound)
    # dense1 params exist in the module's __init__ but are unused in forward().
    _dense1_w = jax.random.uniform(k5, (HIDDEN, HIDDEN), jnp.float32, -bound, bound)

    x = jax.random.normal(kx, (B, T, INPUT_SIZE), jnp.float32)

    output, h_last, c_last = single_lstm_forward(x, w_ih, w_hh, b_ih, b_hh)
    jax.block_until_ready((output, h_last, c_last))

    ref_out, ref_h, ref_c = _reference_lstm(x, w_ih, w_hh, b_ih, b_hh)
    assert output.shape == (B, T, HIDDEN)
    assert h_last.shape == (B, HIDDEN) and c_last.shape == (B, HIDDEN)
    # Tolerance loosened from 1e-5: the recurrent matmul now runs with bf16 inputs
    # (f32 accumulation); the c-state chain itself stays f32.
    assert jnp.allclose(output, ref_out, atol=2e-2, rtol=2e-2)
    assert jnp.allclose(h_last, ref_h, atol=2e-2, rtol=2e-2)
    assert jnp.allclose(c_last, ref_c, atol=2e-2, rtol=2e-2)

    print("KERNEL_OK")
</pallas_src>

<mosaic_0001>
module attributes {stable_mosaic.version = 11 : i64} {
  func.func @kernel(%arg0: i32, %arg1: i32, %arg2: memref<2x8x4xf32, #tpu.memory_space<vmem>>, %arg3: memref<4x128xf32, #tpu.memory_space<vmem>>, %arg4: memref<1x128xf32, #tpu.memory_space<vmem>>, %arg5: memref<32x128xf32, #tpu.memory_space<vmem>>, %arg6: memref<2x8x32xf32, #tpu.memory_space<vmem>>, %arg7: memref<2x32xf32, #tpu.memory_space<vmem>>, %arg8: memref<2x32xf32, #tpu.memory_space<vmem>>, %arg9: memref<2x8x128xf32, #tpu.memory_space<vmem>>) attributes {dimension_semantics = [#tpu.dimension_semantics<parallel>, #tpu.dimension_semantics<arbitrary>], iteration_bounds = array<i64: 1, 1>, scalar_prefetch = 0 : i64, scratch_operands = 1 : i64, tpu.core_type = #tpu.core_type<tc>, window_params = [{transform_indices = @transform_0, window_bounds = array<i64: 2, 8, 4>}, {pipeline_mode = #tpu.pipeline_mode<synchronous>, transform_indices = @transform_1, window_bounds = array<i64: 4, 128>}, {pipeline_mode = #tpu.pipeline_mode<synchronous>, transform_indices = @transform_2, window_bounds = array<i64: 1, 128>}, {pipeline_mode = #tpu.pipeline_mode<synchronous>, transform_indices = @transform_3, window_bounds = array<i64: 32, 128>}, {transform_indices = @transform_4, window_bounds = array<i64: 2, 8, 32>}, {transform_indices = @transform_5, window_bounds = array<i64: 2, 32>}, {transform_indices = @transform_6, window_bounds = array<i64: 2, 32>}]} {
    %c0_i32 = arith.constant 0 : i32
    %0 = arith.cmpi eq, %arg1, %c0_i32 : i32
    %1 = arith.extui %0 : i1 to i32
    %c0_i32_0 = arith.constant 0 : i32
    %2 = arith.cmpi ne, %1, %c0_i32_0 : i32
    scf.if %2 {
      %cst_73 = arith.constant 0.000000e+00 : f32
      %198 = vector.broadcast %cst_73 : f32 to vector<2x32xf32>
      %c0_74 = arith.constant 0 : index
      %c0_75 = arith.constant 0 : index
      %199 = vector.load %arg7[%c0_74, %c0_75] : memref<2x32xf32, #tpu.memory_space<vmem>>, vector<2x32xf32>
      tpu.vector_store %arg7[%c0_74, %c0_75], %198 {strides = array<i32>} : memref<2x32xf32, #tpu.memory_space<vmem>>, vector<2x32xf32>,
      %cst_76 = arith.constant 0.000000e+00 : f32
      %200 = vector.broadcast %cst_76 : f32 to vector<2x32xf32>
      %c0_77 = arith.constant 0 : index
      %c0_78 = arith.constant 0 : index
      %201 = vector.load %arg8[%c0_77, %c0_78] : memref<2x32xf32, #tpu.memory_space<vmem>>, vector<2x32xf32>
      tpu.vector_store %arg8[%c0_77, %c0_78], %200 {strides = array<i32>} : memref<2x32xf32, #tpu.memory_space<vmem>>, vector<2x32xf32>,
    } else {
    }
    %c0 = arith.constant 0 : index
    %c0_1 = arith.constant 0 : index
    %c0_2 = arith.constant 0 : index
    %3 = vector.load %arg2[%c0, %c0_1, %c0_2] : memref<2x8x4xf32, #tpu.memory_space<vmem>>, vector<2x8x4xf32>
    %4 = vector.shape_cast %3 : vector<2x8x4xf32> to vector<16x4xf32>
    %c0_3 = arith.constant 0 : index
    %c0_4 = arith.constant 0 : index
    %5 = vector.load %arg3[%c0_3, %c0_4] : memref<4x128xf32, #tpu.memory_space<vmem>>, vector<4x128xf32>
    %cst = arith.constant dense<0.000000e+00> : vector<16x128xf32>
    %6 = tpu.matmul %4, %5, %cst {dimension_numbers = #tpu.dot_dimension_numbers<[1], [0], [0], [1], [0, 0, 1, 1], [], []>} : vector<16x4xf32>, vector<4x128xf32>, vector<16x128xf32> -> vector<16x128xf32>
    %c0_5 = arith.constant 0 : index
    %c0_6 = arith.constant 0 : index
    %7 = vector.load %arg4[%c0_5, %c0_6] : memref<1x128xf32, #tpu.memory_space<vmem>>, vector<1x128xf32>
    %8 = vector.broadcast %7 : vector<1x128xf32> to vector<16x128xf32>
    %9 = arith.addf %6, %8 : vector<16x128xf32>
    %10 = vector.shape_cast %9 : vector<16x128xf32> to vector<2x8x128xf32>
    %c0_7 = arith.constant 0 : index
    %c0_8 = arith.constant 0 : index
    %c0_9 = arith.constant 0 : index
    %11 = vector.load %arg9[%c0_7, %c0_8, %c0_9] : memref<2x8x128xf32, #tpu.memory_space<vmem>>, vector<2x8x128xf32>
    tpu.vector_store %arg9[%c0_7, %c0_8, %c0_9], %10 {strides = array<i32>} : memref<2x8x128xf32, #tpu.memory_space<vmem>>, vector<2x8x128xf32>,
    %c0_10 = arith.constant 0 : index
    %c0_11 = arith.constant 0 : index
    %12 = vector.load %arg5[%c0_10, %c0_11] : memref<32x128xf32, #tpu.memory_space<vmem>>, vector<32x128xf32>
    %13 = arith.truncf %12 : vector<32x128xf32> to vector<32x128xbf16>
    %14 = tpu.iota {dimensions = array<i32: 1>} : vector<2x128xi32>
    %c64_i32 = arith.constant 64 : i32
    %15 = vector.broadcast %c64_i32 : i32 to vector<2x128xi32>
    %16 = arith.cmpi sge, %14, %15 : vector<2x128xi32>
    %c96_i32 = arith.constant 96 : i32
    %17 = vector.broadcast %c96_i32 : i32 to vector<2x128xi32>
    %18 = arith.cmpi slt, %14, %17 : vector<2x128xi32>
    %19 = arith.andi %16, %18 : vector<2x128xi1>
    %cst_12 = arith.constant 1.000000e+00 : f32
    %cst_13 = arith.constant 5.000000e-01 : f32
    %20 = vector.broadcast %cst_12 : f32 to vector<2x128xf32>
    %21 = vector.broadcast %cst_13 : f32 to vector<2x128xf32>
    %22 = arith.select %19, %20, %21 : vector<2x128xi1>, vector<2x128xf32>
    %cst_14 = arith.constant 0.000000e+00 : f32
    %cst_15 = arith.constant 5.000000e-01 : f32
    %23 = vector.broadcast %cst_14 : f32 to vector<2x128xf32>
    %24 = vector.broadcast %cst_15 : f32 to vector<2x128xf32>
    %25 = arith.select %19, %23, %24 : vector<2x128xi1>, vector<2x128xf32>
    %c0_16 = arith.constant 0 : index
    %c0_17 = arith.constant 0 : index
    %26 = vector.load %arg7[%c0_16, %c0_17] : memref<2x32xf32, #tpu.memory_space<vmem>>, vector<2x32xf32>
    %c0_18 = arith.constant 0 : index
    %c0_19 = arith.constant 0 : index
    %27 = vector.load %arg8[%c0_18, %c0_19] : memref<2x32xf32, #tpu.memory_space<vmem>>, vector<2x32xf32>
    %c0_20 = arith.constant 0 : index
    %c0_21 = arith.constant 0 : index
    %c0_22 = arith.constant 0 : index
    %28 = vector.load %arg9[%c0_20, %c0_21, %c0_22] : memref<2x8x128xf32, #tpu.memory_space<vmem>>, vector<2x1x128xf32>
    %29 = vector.shape_cast %28 : vector<2x1x128xf32> to vector<2x128xf32>
    %30 = arith.truncf %26 : vector<2x32xf32> to vector<2x32xbf16>
    %cst_23 = arith.constant dense<0.000000e+00> : vector<2x128xf32>
    %31 = tpu.matmul %30, %13, %cst_23 {dimension_numbers = #tpu.dot_dimension_numbers<[1], [0], [0], [1], [0, 0, 1, 1], [], []>} : vector<2x32xbf16>, vector<32x128xbf16>, vector<2x128xf32> -> vector<2x128xf32>
    %32 = arith.addf %29, %31 : vector<2x128xf32>
    %33 = arith.mulf %32, %22 : vector<2x128xf32>
    %34 = math.tanh %33 : vector<2x128xf32>
    %35 = arith.mulf %34, %22 : vector<2x128xf32>
    %36 = arith.addf %35, %25 : vector<2x128xf32>
    %37 = vector.extract_strided_slice %36 {offsets = [0, 0], sizes = [2, 32], strides = [1, 1]} : vector<2x128xf32> to vector<2x32xf32>
    %38 = vector.extract_strided_slice %36 {offsets = [0, 32], sizes = [2, 32], strides = [1, 1]} : vector<2x128xf32> to vector<2x32xf32>
    %39 = vector.extract_strided_slice %36 {offsets = [0, 64], sizes = [2, 32], strides = [1, 1]} : vector<2x128xf32> to vector<2x32xf32>
    %40 = vector.extract_strided_slice %36 {offsets = [0, 96], sizes = [2, 32], strides = [1, 1]} : vector<2x128xf32> to vector<2x32xf32>
    %41 = arith.mulf %38, %27 : vector<2x32xf32>
    %42 = arith.mulf %37, %39 : vector<2x32xf32>
    %43 = arith.addf %41, %42 : vector<2x32xf32>
    %44 = math.tanh %43 : vector<2x32xf32>
    %45 = arith.mulf %40, %44 : vector<2x32xf32>
    %c0_24 = arith.constant 0 : index
    %c0_25 = arith.constant 0 : index
    %c0_26 = arith.constant 0 : index
    %46 = vector.load %arg6[%c0_24, %c0_25, %c0_26] : memref<2x8x32xf32, #tpu.memory_space<vmem>>, vector<2x1x32xf32>
    %47 = vector.shape_cast %46 : vector<2x1x32xf32> to vector<2x32xf32>
    %48 = vector.shape_cast %45 : vector<2x32xf32> to vector<2x1x32xf32>
    tpu.vector_store %arg6[%c0_24, %c0_25, %c0_26], %48 {strides = array<i32>} : memref<2x8x32xf32, #tpu.memory_space<vmem>>, vector<2x1x32xf32>,
    %c0_27 = arith.constant 0 : index
    %c1 = arith.constant 1 : index
    %c0_28 = arith.constant 0 : index
    %49 = vector.load %arg9[%c0_27, %c1, %c0_28] : memref<2x8x128xf32, #tpu.memory_space<vmem>>, vector<2x1x128xf32>
    %50 = vector.shape_cast %49 : vector<2x1x128xf32> to vector<2x128xf32>
    %51 = arith.truncf %45 : vector<2x32xf32> to vector<2x32xbf16>
    %cst_29 = arith.constant dense<0.000000e+00> : vector<2x128xf32>
    %52 = tpu.matmul %51, %13, %cst_29 {dimension_numbers = #tpu.dot_dimension_numbers<[1], [0], [0], [1], [0, 0, 1, 1], [], []>} : vector<2x32xbf16>, vector<32x128xbf16>, vector<2x128xf32> -> vector<2x128xf32>
    %53 = arith.addf %50, %52 : vector<2x128xf32>
    %54 = arith.mulf %53, %22 : vector<2x128xf32>
    %55 = math.tanh %54 : vector<2x128xf32>
    %56 = arith.mulf %55, %22 : vector<2x128xf32>
    %57 = arith.addf %56, %25 : vector<2x128xf32>
    %58 = vector.extract_strided_slice %57 {offsets = [0, 0], sizes = [2, 32], strides = [1, 1]} : vector<2x128xf32> to vector<2x32xf32>
    %59 = vector.extract_strided_slice %57 {offsets = [0, 32], sizes = [2, 32], strides = [1, 1]} : vector<2x128xf32> to vector<2x32xf32>
    %60 = vector.extract_strided_slice %57 {offsets = [0, 64], sizes = [2, 32], strides = [1, 1]} : vector<2x128xf32> to vector<2x32xf32>
    %61 = vector.extract_strided_slice %57 {offsets = [0, 96], sizes = [2, 32], strides = [1, 1]} : vector<2x128xf32> to vector<2x32xf32>
    %62 = arith.mulf %59, %43 : vector<2x32xf32>
    %63 = arith.mulf %58, %60 : vector<2x32xf32>
    %64 = arith.addf %62, %63 : vector<2x32xf32>
    %65 = math.tanh %64 : vector<2x32xf32>
    %66 = arith.mulf %61, %65 : vector<2x32xf32>
    %c0_30 = arith.constant 0 : index
    %c1_31 = arith.constant 1 : index
    %c0_32 = arith.constant 0 : index
    %67 = vector.load %arg6[%c0_30, %c1_31, %c0_32] : memref<2x8x32xf32, #tpu.memory_space<vmem>>, vector<2x1x32xf32>
    %68 = vector.shape_cast %67 : vector<2x1x32xf32> to vector<2x32xf32>
    %69 = vector.shape_cast %66 : vector<2x32xf32> to vector<2x1x32xf32>
    tpu.vector_store %arg6[%c0_30, %c1_31, %c0_32], %69 {strides = array<i32>} : memref<2x8x32xf32, #tpu.memory_space<vmem>>, vector<2x1x32xf32>,
    %c0_33 = arith.constant 0 : index
    %c2 = arith.constant 2 : index
    %c0_34 = arith.constant 0 : index
    %70 = vector.load %arg9[%c0_33, %c2, %c0_34] : memref<2x8x128xf32, #tpu.memory_space<vmem>>, vector<2x1x128xf32>
    %71 = vector.shape_cast %70 : vector<2x1x128xf32> to vector<2x128xf32>
    %72 = arith.truncf %66 : vector<2x32xf32> to vector<2x32xbf16>
    %cst_35 = arith.constant dense<0.000000e+00> : vector<2x128xf32>
    %73 = tpu.matmul %72, %13, %cst_35 {dimension_numbers = #tpu.dot_dimension_numbers<[1], [0], [0], [1], [0, 0, 1, 1], [], []>} : vector<2x32xbf16>, vector<32x128xbf16>, vector<2x128xf32> -> vector<2x128xf32>
    %74 = arith.addf %71, %73 : vector<2x128xf32>
    %75 = arith.mulf %74, %22 : vector<2x128xf32>
    %76 = math.tanh %75 : vector<2x128xf32>
    %77 = arith.mulf %76, %22 : vector<2x128xf32>
    %78 = arith.addf %77, %25 : vector<2x128xf32>
    %79 = vector.extract_strided_slice %78 {offsets = [0, 0], sizes = [2, 32], strides = [1, 1]} : vector<2x128xf32> to vector<2x32xf32>
    %80 = vector.extract_strided_slice %78 {offsets = [0, 32], sizes = [2, 32], strides = [1, 1]} : vector<2x128xf32> to vector<2x32xf32>
    %81 = vector.extract_strided_slice %78 {offsets = [0, 64], sizes = [2, 32], strides = [1, 1]} : vector<2x128xf32> to vector<2x32xf32>
    %82 = vector.extract_strided_slice %78 {offsets = [0, 96], sizes = [2, 32], strides = [1, 1]} : vector<2x128xf32> to vector<2x32xf32>
    %83 = arith.mulf %80, %64 : vector<2x32xf32>
    %84 = arith.mulf %79, %81 : vector<2x32xf32>
    %85 = arith.addf %83, %84 : vector<2x32xf32>
    %86 = math.tanh %85 : vector<2x32xf32>
    %87 = arith.mulf %82, %86 : vector<2x32xf32>
    %c0_36 = arith.constant 0 : index
    %c2_37 = arith.constant 2 : index
    %c0_38 = arith.constant 0 : index
    %88 = vector.load %arg6[%c0_36, %c2_37, %c0_38] : memref<2x8x32xf32, #tpu.memory_space<vmem>>, vector<2x1x32xf32>
    %89 = vector.shape_cast %88 : vector<2x1x32xf32> to vector<2x32xf32>
    %90 = vector.shape_cast %87 : vector<2x32xf32> to vector<2x1x32xf32>
    tpu.vector_store %arg6[%c0_36, %c2_37, %c0_38], %90 {strides = array<i32>} : memref<2x8x32xf32, #tpu.memory_space<vmem>>, vector<2x1x32xf32>,
    %c0_39 = arith.constant 0 : index
    %c3 = arith.constant 3 : index
    %c0_40 = arith.constant 0 : index
    %91 = vector.load %arg9[%c0_39, %c3, %c0_40] : memref<2x8x128xf32, #tpu.memory_space<vmem>>, vector<2x1x128xf32>
    %92 = vector.shape_cast %91 : vector<2x1x128xf32> to vector<2x128xf32>
    %93 = arith.truncf %87 : vector<2x32xf32> to vector<2x32xbf16>
    %cst_41 = arith.constant dense<0.000000e+00> : vector<2x128xf32>
    %94 = tpu.matmul %93, %13, %cst_41 {dimension_numbers = #tpu.dot_dimension_numbers<[1], [0], [0], [1], [0, 0, 1, 1], [], []>} : vector<2x32xbf16>, vector<32x128xbf16>, vector<2x128xf32> -> vector<2x128xf32>
    %95 = arith.addf %92, %94 : vector<2x128xf32>
    %96 = arith.mulf %95, %22 : vector<2x128xf32>
    %97 = math.tanh %96 : vector<2x128xf32>
    %98 = arith.mulf %97, %22 : vector<2x128xf32>
    %99 = arith.addf %98, %25 : vector<2x128xf32>
    %100 = vector.extract_strided_slice %99 {offsets = [0, 0], sizes = [2, 32], strides = [1, 1]} : vector<2x128xf32> to vector<2x32xf32>
    %101 = vector.extract_strided_slice %99 {offsets = [0, 32], sizes = [2, 32], strides = [1, 1]} : vector<2x128xf32> to vector<2x32xf32>
    %102 = vector.extract_strided_slice %99 {offsets = [0, 64], sizes = [2, 32], strides = [1, 1]} : vector<2x128xf32> to vector<2x32xf32>
    %103 = vector.extract_strided_slice %99 {offsets = [0, 96], sizes = [2, 32], strides = [1, 1]} : vector<2x128xf32> to vector<2x32xf32>
    %104 = arith.mulf %101, %85 : vector<2x32xf32>
    %105 = arith.mulf %100, %102 : vector<2x32xf32>
    %106 = arith.addf %104, %105 : vector<2x32xf32>
    %107 = math.tanh %106 : vector<2x32xf32>
    %108 = arith.mulf %103, %107 : vector<2x32xf32>
    %c0_42 = arith.constant 0 : index
    %c3_43 = arith.constant 3 : index
    %c0_44 = arith.constant 0 : index
    %109 = vector.load %arg6[%c0_42, %c3_43, %c0_44] : memref<2x8x32xf32, #tpu.memory_space<vmem>>, vector<2x1x32xf32>
    %110 = vector.shape_cast %109 : vector<2x1x32xf32> to vector<2x32xf32>
    %111 = vector.shape_cast %108 : vector<2x32xf32> to vector<2x1x32xf32>
    tpu.vector_store %arg6[%c0_42, %c3_43, %c0_44], %111 {strides = array<i32>} : memref<2x8x32xf32, #tpu.memory_space<vmem>>, vector<2x1x32xf32>,
    %c0_45 = arith.constant 0 : index
    %c4 = arith.constant 4 : index
    %c0_46 = arith.constant 0 : index
    %112 = vector.load %arg9[%c0_45, %c4, %c0_46] : memref<2x8x128xf32, #tpu.memory_space<vmem>>, vector<2x1x128xf32>
    %113 = vector.shape_cast %112 : vector<2x1x128xf32> to vector<2x128xf32>
    %114 = arith.truncf %108 : vector<2x32xf32> to vector<2x32xbf16>
    %cst_47 = arith.constant dense<0.000000e+00> : vector<2x128xf32>
    %115 = tpu.matmul %114, %13, %cst_47 {dimension_numbers = #tpu.dot_dimension_numbers<[1], [0], [0], [1], [0, 0, 1, 1], [], []>} : vector<2x32xbf16>, vector<32x128xbf16>, vector<2x128xf32> -> vector<2x128xf32>
    %116 = arith.addf %113, %115 : vector<2x128xf32>
    %117 = arith.mulf %116, %22 : vector<2x128xf32>
    %118 = math.tanh %117 : vector<2x128xf32>
    %119 = arith.mulf %118, %22 : vector<2x128xf32>
    %120 = arith.addf %119, %25 : vector<2x128xf32>
    %121 = vector.extract_strided_slice %120 {offsets = [0, 0], sizes = [2, 32], strides = [1, 1]} : vector<2x128xf32> to vector<2x32xf32>
    %122 = vector.extract_strided_slice %120 {offsets = [0, 32], sizes = [2, 32], strides = [1, 1]} : vector<2x128xf32> to vector<2x32xf32>
    %123 = vector.extract_strided_slice %120 {offsets = [0, 64], sizes = [2, 32], strides = [1, 1]} : vector<2x128xf32> to vector<2x32xf32>
    %124 = vector.extract_strided_slice %120 {offsets = [0, 96], sizes = [2, 32], strides = [1, 1]} : vector<2x128xf32> to vector<2x32xf32>
    %125 = arith.mulf %122, %106 : vector<2x32xf32>
    %126 = arith.mulf %121, %123 : vector<2x32xf32>
    %127 = arith.addf %125, %126 : vector<2x32xf32>
    %128 = math.tanh %127 : vector<2x32xf32>
    %129 = arith.mulf %124, %128 : vector<2x32xf32>
    %c0_48 = arith.constant 0 : index
    %c4_49 = arith.constant 4 : index
    %c0_50 = arith.constant 0 : index
    %130 = vector.load %arg6[%c0_48, %c4_49, %c0_50] : memref<2x8x32xf32, #tpu.memory_space<vmem>>, vector<2x1x32xf32>
    %131 = vector.shape_cast %130 : vector<2x1x32xf32> to vector<2x32xf32>
    %132 = vector.shape_cast %129 : vector<2x32xf32> to vector<2x1x32xf32>
    tpu.vector_store %arg6[%c0_48, %c4_49, %c0_50], %132 {strides = array<i32>} : memref<2x8x32xf32, #tpu.memory_space<vmem>>, vector<2x1x32xf32>,
    %c0_51 = arith.constant 0 : index
    %c5 = arith.constant 5 : index
    %c0_52 = arith.constant 0 : index
    %133 = vector.load %arg9[%c0_51, %c5, %c0_52] : memref<2x8x128xf32, #tpu.memory_space<vmem>>, vector<2x1x128xf32>
    %134 = vector.shape_cast %133 : vector<2x1x128xf32> to vector<2x128xf32>
    %135 = arith.truncf %129 : vector<2x32xf32> to vector<2x32xbf16>
    %cst_53 = arith.constant dense<0.000000e+00> : vector<2x128xf32>
    %136 = tpu.matmul %135, %13, %cst_53 {dimension_numbers = #tpu.dot_dimension_numbers<[1], [0], [0], [1], [0, 0, 1, 1], [], []>} : vector<2x32xbf16>, vector<32x128xbf16>, vector<2x128xf32> -> vector<2x128xf32>
    %137 = arith.addf %134, %136 : vector<2x128xf32>
    %138 = arith.mulf %137, %22 : vector<2x128xf32>
    %139 = math.tanh %138 : vector<2x128xf32>
    %140 = arith.mulf %139, %22 : vector<2x128xf32>
    %141 = arith.addf %140, %25 : vector<2x128xf32>
    %142 = vector.extract_strided_slice %141 {offsets = [0, 0], sizes = [2, 32], strides = [1, 1]} : vector<2x128xf32> to vector<2x32xf32>
    %143 = vector.extract_strided_slice %141 {offsets = [0, 32], sizes = [2, 32], strides = [1, 1]} : vector<2x128xf32> to vector<2x32xf32>
    %144 = vector.extract_strided_slice %141 {offsets = [0, 64], sizes = [2, 32], strides = [1, 1]} : vector<2x128xf32> to vector<2x32xf32>
    %145 = vector.extract_strided_slice %141 {offsets = [0, 96], sizes = [2, 32], strides = [1, 1]} : vector<2x128xf32> to vector<2x32xf32>
    %146 = arith.mulf %143, %127 : vector<2x32xf32>
    %147 = arith.mulf %142, %144 : vector<2x32xf32>
    %148 = arith.addf %146, %147 : vector<2x32xf32>
    %149 = math.tanh %148 : vector<2x32xf32>
    %150 = arith.mulf %145, %149 : vector<2x32xf32>
    %c0_54 = arith.constant 0 : index
    %c5_55 = arith.constant 5 : index
    %c0_56 = arith.constant 0 : index
    %151 = vector.load %arg6[%c0_54, %c5_55, %c0_56] : memref<2x8x32xf32, #tpu.memory_space<vmem>>, vector<2x1x32xf32>
    %152 = vector.shape_cast %151 : vector<2x1x32xf32> to vector<2x32xf32>
    %153 = vector.shape_cast %150 : vector<2x32xf32> to vector<2x1x32xf32>
    tpu.vector_store %arg6[%c0_54, %c5_55, %c0_56], %153 {strides = array<i32>} : memref<2x8x32xf32, #tpu.memory_space<vmem>>, vector<2x1x32xf32>,
    %c0_57 = arith.constant 0 : index
    %c6 = arith.constant 6 : index
    %c0_58 = arith.constant 0 : index
    %154 = vector.load %arg9[%c0_57, %c6, %c0_58] : memref<2x8x128xf32, #tpu.memory_space<vmem>>, vector<2x1x128xf32>
    %155 = vector.shape_cast %154 : vector<2x1x128xf32> to vector<2x128xf32>
    %156 = arith.truncf %150 : vector<2x32xf32> to vector<2x32xbf16>
    %cst_59 = arith.constant dense<0.000000e+00> : vector<2x128xf32>
    %157 = tpu.matmul %156, %13, %cst_59 {dimension_numbers = #tpu.dot_dimension_numbers<[1], [0], [0], [1], [0, 0, 1, 1], [], []>} : vector<2x32xbf16>, vector<32x128xbf16>, vector<2x128xf32> -> vector<2x128xf32>
    %158 = arith.addf %155, %157 : vector<2x128xf32>
    %159 = arith.mulf %158, %22 : vector<2x128xf32>
    %160 = math.tanh %159 : vector<2x128xf32>
    %161 = arith.mulf %160, %22 : vector<2x128xf32>
    %162 = arith.addf %161, %25 : vector<2x128xf32>
    %163 = vector.extract_strided_slice %162 {offsets = [0, 0], sizes = [2, 32], strides = [1, 1]} : vector<2x128xf32> to vector<2x32xf32>
    %164 = vector.extract_strided_slice %162 {offsets = [0, 32], sizes = [2, 32], strides = [1, 1]} : vector<2x128xf32> to vector<2x32xf32>
    %165 = vector.extract_strided_slice %162 {offsets = [0, 64], sizes = [2, 32], strides = [1, 1]} : vector<2x128xf32> to vector<2x32xf32>
    %166 = vector.extract_strided_slice %162 {offsets = [0, 96], sizes = [2, 32], strides = [1, 1]} : vector<2x128xf32> to vector<2x32xf32>
    %167 = arith.mulf %164, %148 : vector<2x32xf32>
    %168 = arith.mulf %163, %165 : vector<2x32xf32>
    %169 = arith.addf %167, %168 : vector<2x32xf32>
    %170 = math.tanh %169 : vector<2x32xf32>
    %171 = arith.mulf %166, %170 : vector<2x32xf32>
    %c0_60 = arith.constant 0 : index
    %c6_61 = arith.constant 6 : index
    %c0_62 = arith.constant 0 : index
    %172 = vector.load %arg6[%c0_60, %c6_61, %c0_62] : memref<2x8x32xf32, #tpu.memory_space<vmem>>, vector<2x1x32xf32>
    %173 = vector.shape_cast %172 : vector<2x1x32xf32> to vector<2x32xf32>
    %174 = vector.shape_cast %171 : vector<2x32xf32> to vector<2x1x32xf32>
    tpu.vector_store %arg6[%c0_60, %c6_61, %c0_62], %174 {strides = array<i32>} : memref<2x8x32xf32, #tpu.memory_space<vmem>>, vector<2x1x32xf32>,
    %c0_63 = arith.constant 0 : index
    %c7 = arith.constant 7 : index
    %c0_64 = arith.constant 0 : index
    %175 = vector.load %arg9[%c0_63, %c7, %c0_64] : memref<2x8x128xf32, #tpu.memory_space<vmem>>, vector<2x1x128xf32>
    %176 = vector.shape_cast %175 : vector<2x1x128xf32> to vector<2x128xf32>
    %177 = arith.truncf %171 : vector<2x32xf32> to vector<2x32xbf16>
    %cst_65 = arith.constant dense<0.000000e+00> : vector<2x128xf32>
    %178 = tpu.matmul %177, %13, %cst_65 {dimension_numbers = #tpu.dot_dimension_numbers<[1], [0], [0], [1], [0, 0, 1, 1], [], []>} : vector<2x32xbf16>, vector<32x128xbf16>, vector<2x128xf32> -> vector<2x128xf32>
    %179 = arith.addf %176, %178 : vector<2x128xf32>
    %180 = arith.mulf %179, %22 : vector<2x128xf32>
    %181 = math.tanh %180 : vector<2x128xf32>
    %182 = arith.mulf %181, %22 : vector<2x128xf32>
    %183 = arith.addf %182, %25 : vector<2x128xf32>
    %184 = vector.extract_strided_slice %183 {offsets = [0, 0], sizes = [2, 32], strides = [1, 1]} : vector<2x128xf32> to vector<2x32xf32>
    %185 = vector.extract_strided_slice %183 {offsets = [0, 32], sizes = [2, 32], strides = [1, 1]} : vector<2x128xf32> to vector<2x32xf32>
    %186 = vector.extract_strided_slice %183 {offsets = [0, 64], sizes = [2, 32], strides = [1, 1]} : vector<2x128xf32> to vector<2x32xf32>
    %187 = vector.extract_strided_slice %183 {offsets = [0, 96], sizes = [2, 32], strides = [1, 1]} : vector<2x128xf32> to vector<2x32xf32>
    %188 = arith.mulf %185, %169 : vector<2x32xf32>
    %189 = arith.mulf %184, %186 : vector<2x32xf32>
    %190 = arith.addf %188, %189 : vector<2x32xf32>
    %191 = math.tanh %190 : vector<2x32xf32>
    %192 = arith.mulf %187, %191 : vector<2x32xf32>
    %c0_66 = arith.constant 0 : index
    %c7_67 = arith.constant 7 : index
    %c0_68 = arith.constant 0 : index
    %193 = vector.load %arg6[%c0_66, %c7_67, %c0_68] : memref<2x8x32xf32, #tpu.memory_space<vmem>>, vector<2x1x32xf32>
    %194 = vector.shape_cast %193 : vector<2x1x32xf32> to vector<2x32xf32>
    %195 = vector.shape_cast %192 : vector<2x32xf32> to vector<2x1x32xf32>
    tpu.vector_store %arg6[%c0_66, %c7_67, %c0_68], %195 {strides = array<i32>} : memref<2x8x32xf32, #tpu.memory_space<vmem>>, vector<2x1x32xf32>,
    %c0_69 = arith.constant 0 : index
    %c0_70 = arith.constant 0 : index
    %196 = vector.load %arg7[%c0_69, %c0_70] : memref<2x32xf32, #tpu.memory_space<vmem>>, vector<2x32xf32>
    tpu.vector_store %arg7[%c0_69, %c0_70], %192 {strides = array<i32>} : memref<2x32xf32, #tpu.memory_space<vmem>>, vector<2x32xf32>,
    %c0_71 = arith.constant 0 : index
    %c0_72 = arith.constant 0 : index
    %197 = vector.load %arg8[%c0_71, %c0_72] : memref<2x32xf32, #tpu.memory_space<vmem>>, vector<2x32xf32>
    tpu.vector_store %arg8[%c0_71, %c0_72], %190 {strides = array<i32>} : memref<2x32xf32, #tpu.memory_space<vmem>>, vector<2x32xf32>,
    return
  }
  func.func @transform_0(%arg0: i32, %arg1: i32) -> (i32, i32, i32) {
    %c0_i32 = arith.constant 0 : i32
    %c0_i32_0 = arith.constant 0 : i32
    return %arg0, %arg1, %c0_i32 : i32, i32, i32
  }
  func.func @transform_1(%arg0: i32, %arg1: i32) -> (i32, i32) {
    %c0_i32 = arith.constant 0 : i32
    %c0_i32_0 = arith.constant 0 : i32
    %c0_i32_1 = arith.constant 0 : i32
    return %c0_i32, %c0_i32_0 : i32, i32
  }
  func.func @transform_2(%arg0: i32, %arg1: i32) -> (i32, i32) {
    %c0_i32 = arith.constant 0 : i32
    %c0_i32_0 = arith.constant 0 : i32
    %c0_i32_1 = arith.constant 0 : i32
    return %c0_i32, %c0_i32_0 : i32, i32
  }
  func.func @transform_3(%arg0: i32, %arg1: i32) -> (i32, i32) {
    %c0_i32 = arith.constant 0 : i32
    %c0_i32_0 = arith.constant 0 : i32
    %c0_i32_1 = arith.constant 0 : i32
    return %c0_i32, %c0_i32_0 : i32, i32
  }
  func.func @transform_4(%arg0: i32, %arg1: i32) -> (i32, i32, i32) {
    %c0_i32 = arith.constant 0 : i32
    %c0_i32_0 = arith.constant 0 : i32
    return %arg0, %arg1, %c0_i32 : i32, i32, i32
  }
  func.func @transform_5(%arg0: i32, %arg1: i32) -> (i32, i32) {
    %c0_i32 = arith.constant 0 : i32
    %c0_i32_0 = arith.constant 0 : i32
    return %arg0, %c0_i32 : i32, i32
  }
  func.func @transform_6(%arg0: i32, %arg1: i32) -> (i32, i32) {
    %c0_i32 = arith.constant 0 : i32
    %c0_i32_0 = arith.constant 0 : i32
    return %arg0, %c0_i32 : i32, i32
  }
}

</mosaic_0001>

<bundles_post_ra>
// kernel: single_lstm_forward.1
= control target key start
LH: loop header
LB: loop body
LE: loop exit
PB: predicated region body
PF: predicated region fallthrough
CT: control target
= control target key end

     0   :  { %12 = vsyncpa [#allocation4], 0  ;;  %vm47_vm0 = vcmask 1043456   ;;  %vm40_vm1 = vcmask 31744   ;;  %vm27_vm2 = vcmask 254976   ;;  %v1367_v6 = vmov 0.0   ;;  %s1777_s0 = inlined_call_operand.vmem [shape: f32[2,8,4], index: 0, kind: input, shape index: {}]   ;;  %s1778_s1 = inlined_call_operand.vmem [shape: f32[4,128], index: 1, kind: input, shape index: {}]   ;;  %s1779_s2 = inlined_call_operand.vmem [shape: f32[1,128], index: 2, kind: input, shape index: {}]   ;;  %s1780_s3 = inlined_call_operand.vmem [shape: f32[32,128], index: 3, kind: input, shape index: {}]   ;;  %s1781_s4 = inlined_call_operand.hbm [shape: f32[2,8,32], index: 4, kind: output, shape index: {0}]   ;;  %s1782_s5 = inlined_call_operand.hbm [shape: f32[2,32], index: 5, kind: output, shape index: {1}]   ;;  %s1783_s6 = inlined_call_operand.hbm [shape: f32[2,32], index: 6, kind: output, shape index: {2}]  }
   0x1   :  { %v32_v0 = vld [vmem:[%s1778_s1] sm:$0xf]  ;;  %v31_v2 = vld [vmem:[%s1777_s0 + $0x8] sm:$0xff]  ;;  %v130_v5 = vld [vmem:[%s1780_s3 + $0x10] sm:$0xff]  ;;  %1158 = vmatprep.subr.bf16.mxu1 %v1367_v6  ;;  %28 = vst.msk [vmem:[#allocation5] sm:$0x3] %vm27_vm2, %v1367_v6 }
   0x2   :  { %v30_v1 = vld [vmem:[%s1777_s0] sm:$0xff]  ;;  %1153 = vmatprep.subr.msk.mxu0 %vm47_vm0, %v32_v0  ;;  %v129_v4 = vld [vmem:[%s1780_s3 + $0x8] sm:$0xff]  ;;  %v131_v8 = vld [vmem:[%s1780_s3 + $0x18] sm:$0xff]  ;;  %29 = vst.msk [vmem:[#allocation7] sm:$0x3] %vm27_vm2, %v1367_v6 }
   0x3   :  { %1155 = vmatprep.mubr.msk.f32.mxu0 %vm40_vm1, %v30_v1  ;;  %v128_v3 = vld [vmem:[%s1780_s3] sm:$0xff]  ;;  %1154 = vmatpush3.msk.msra.mxu0 %vm47_vm0, %v32_v0 }
   0x4   :  { %v1433_v7 = vpack.c.bf16 %v129_v4, %v128_v3 }
   0x5   :  { %13 = vsyncpa [#allocation6], 0  ;;  %1156 = vmatmul.mubr.msk.f32.vlgmr.msra.gmra.mrb[0].mxu0 %vm40_vm1, %v31_v2  ;;  %vm1368_vm3 = vmmov 0   ;;  %v1446_v9 = vpack.c.bf16 %v131_v8, %v130_v5  ;;  %1166 = vmatprep.subr.bf16.mxu0 %v1367_v6  ;;  %vm146_vm4 = vcmask 261120   ;;  %s1369_s3 = smov 32   ;;  %v134_v14 = vlaneseq  ;;  %s1372_s11 = smov 96  }
   0x6   :  { %1162 = vmatprep.mubr.msk.bf16.mxu1 %vm1368_vm3, %v1367_v6  ;;  %1159 = vmatpush3.bf16.msra.mxu1 %v1433_v7  ;;  %v1114_v15 = vld [vmem:[%s1779_s2] ss:$0 sm:$0xff]  ;;  %v1370_v26 = vmov 0.5   ;;  %s1371_s2 = smov 64   ;;  %vm266_vm8 = vcmask 1041409   ;;  %vm254_vm9 = vcmask 253952  }
   0x7   :  { %1160 = vmatprep.subr.bf16.mxu1 %v1367_v6  ;;  %1167 = vmatpush3.bf16.msra.mxu0 %v1433_v7  ;;  %v135_v19 = vand.u32 127, %v134_v14  ;;  %s1373_s12 = smov [#allocation5]   ;;  %s1374_s14 = smov [#allocation3]  }
   0x8   :  { %1168 = vmatprep.subr.bf16.mxu0 %v1367_v6  ;;  %1170 = vmatprep.mubr.msk.bf16.mxu0 %vm1368_vm3, %v1367_v6  ;;  %v141_v10 = vld [vmem:[#allocation5] sm:$0x3]  ;;  %s1089_s13 = sshll.u32 %s1373_s12, 4  ;;  %s1076_s15 = sshll.u32 %s1374_s14, 4  ;;  %s1090_s13 = int_to_ptr.vmem [resolvable:$true] %s1089_s13  ;;  %s1732_s15 = int_to_ptr.vmem [resolvable:$true] %s1076_s15 }
   0x9   :  { %v142_v11 = vld [vmem:[#allocation7] sm:$0x3]  ;;  %v145_v12 = vpack.c.bf16 %v141_v10, %v141_v10  ;;  %vm136_vm5 = vcmp.ge.s32.totalorder %v135_v19, 64  ;;  %vm137_vm6 = vcmp.lt.s32.totalorder %v135_v19, 96  ;;  %s1375_s16 = smov [#allocation7]   ;;  %s1297_s18 = scalar_lea.vmem %s1090_s13, 32 }
   0xa   :  { %1161 = vmatpush3.bf16.msra.mxu1 %v1446_v9  ;;  %v205_v13 = vrot.slane %v142_v11, 1  ;;  %vm1470_vm7 = vmand %vm136_vm5, %vm137_vm6  ;;  %s1099_s17 = sshll.u32 %s1375_s16, 4  ;;  %p1298_p0 = scmp.ne.s32.totalorder %s1090_s13, %s1297_s18  ;;  %s1100_s17 = int_to_ptr.vmem [resolvable:$true] %s1099_s17 }
   0xb   :  { %1169 = vmatpush3.bf16.msra.mxu0 %v1446_v9  ;;  %1174 = vmatprep.subr.bf16.mxu1 %v1367_v6  ;;  %v1476_v27 = vsel %vm1470_vm7, 1.0, %v1370_v26  ;;  %v1482_v37 = vsel %vm1470_vm7, 0.0, %v1370_v26  ;;  %p1302_p1 = scmp.lt.s32.totalorder %s1090_s13, %s1090_s13  ;;  %p1303_p2 = scmp.lt.s32.totalorder %s1297_s18, %s1297_s18 }
   0xc   :  { %1182 = vmatprep.subr.bf16.mxu0 %v1367_v6  ;;  %208 = vrot.lane.b32.xlu1 %v205_v13, %s1369_s3 }
   0xd   :  { %1163 = vmatmul.mubr.msk.bf16.vlgmr.msra.gmra.mrb[0].mxu1 %vm146_vm4, %v145_v12  ;;  %p1304_p3 = por %p1303_p2, %p1302_p1 }
   0xe   :  { %1175 = vmatpush3.bf16.msra.mxu1 %v1433_v7  ;;  %1178 = vmatprep.mubr.msk.bf16.mxu1 %vm1368_vm3, %v1367_v6 }
   0xf   :  { %1176 = vmatprep.subr.bf16.mxu1 %v1367_v6  ;;  %p1305_p4 = pnand %p1304_p3, %p1298_p0 }
  0x10   :  { %206 = vrot.lane.b32.xlu1 %v142_v11, %s1369_s3 }
  0x12   :  { %1177 = vmatpush3.bf16.msra.mxu1 %v1446_v9 }
  0x13   :  { %1190 = vmatprep.subr.bf16.mxu1 %v1367_v6 }
  0x7e   :  { %v209_v46 = vpop.permute.xlu1 %208 }
  0x82   :  { %v207_v48 = vpop.permute.xlu1 %206 }
  0xd8   :  { %v1157_v16 = vpop.f32.mrb[0].mxu0 }
  0xd9   :  { %v123_v17 = vadd.f32 %v1157_v16, %v1114_v15  ;;  %v117_v18 = vpop.f32.mrb[1].mxu0 }
  0xda   :  { %v118_v20 = vadd.f32 %v1114_v15, %v117_v18 }
  0xdb   :  { %127 = vst [vmem:[#allocation2 + $0x8] sm:$0xff] %v123_v17 }
  0xdc   :  { %126 = vst [vmem:[#allocation2] sm:$0xff] %v118_v20 }
  0xe0   :  { %v184_v22 = vpop.f32.mrb[0].mxu1 }
  0xe1   :  { %v191_v24 = vrot.slane %v184_v22, 1  ;;  %v1164_v25 = vpop.f32.mrb[1].mxu1 }
  0xe2   :  { %v144_v23 = vld [vmem:[#allocation2 + $0x8] sm:$0x1]  ;;  %v187_v29 = vpop.f32.mrb[2].mxu1  ;;  %v258_v12 = vld [vmem:[#allocation2 + $0x9] sm:$0x1] }
  0xe3   :  { %v143_v28 = vld [vmem:[#allocation2] sm:$0x1]  ;;  %v195_v31 = vadd.f32 %v191_v24, %v144_v23  ;;  %v1165_v32 = vpop.f32.mrb[3].mxu1  ;;  %v257_v4 = vld [vmem:[#allocation2 + $0x1] sm:$0x1] }
  0xe4   :  { %v194_v30 = vadd.f32 %v184_v22, %v143_v28 }
  0xe5   :  { %v197_v34 = vmul.f32 %v195_v31, %v1476_v27 }
  0xe6   :  { %v196_v33 = vmul.f32 %v194_v30, %v1476_v27 }
  0xe8   :  { %1233 = vtanh.f32 %v196_v33 }
  0xe9   :  { %1235 = vtanh.f32 %v197_v34 }
  0xf2   :  { %v1234_v35 = vpop.eup %1233 }
  0xf3   :  { %v1236_v36 = vpop.eup %1235  ;;  %v200_v40 = vmul.f32 %v1234_v35, %v1476_v27 }
  0xf4   :  { %v201_v38 = vmul.f32 %v1236_v36, %v1476_v27 }
  0xf5   :  { %v202_v41 = vadd.f32 %v200_v40, %v1482_v37 }
  0xf6   :  { %v203_v39 = vadd.f32 %v201_v38, %v1482_v37 }
  0xf7   :  { %v212_v51 = vmul.f32 %v207_v48, %v202_v41 }
  0xf8   :  { %218 = vrot.lane.b32.xlu0 %v203_v39, %s1371_s2  ;;  %v213_v47 = vmul.f32 %v209_v46, %v203_v39 }
  0xfc   :  { %216 = vrot.lane.b32.xlu0 %v202_v41, %s1371_s2 }
 0x16a   :  { %v219_v42 = vpop.permute.xlu0 %218 }
 0x16b   :  { %v223_v43 = vmul.f32 %v219_v42, %v203_v39 }
 0x16d   :  { %228 = vrot.lane.b32.xlu0 %v223_v43, %s1369_s3 }
 0x16e   :  { %v217_v44 = vpop.permute.xlu0 %216 }
 0x16f   :  { %v222_v45 = vmul.f32 %v217_v44, %v202_v41 }
 0x171   :  { %226 = vrot.lane.b32.xlu1 %v222_v45, %s1369_s3 }
 0x1df   :  { %v229_v49 = vpop.permute.xlu0 %228 }
 0x1e0   :  { %v233_v50 = vadd.f32 %v229_v49, %v213_v47 }
 0x1e2   :  { %1237 = vtanh.f32 %v233_v50 }
 0x1e3   :  { %v227_v52 = vpop.permute.xlu1 %226 }
 0x1e4   :  { %v232_v53 = vadd.f32 %v227_v52, %v212_v51 }
 0x1e6   :  { %1239 = vtanh.f32 %v232_v53 }
 0x1ec   :  { %v1238_v54 = vpop.eup %1237 }
 0x1ed   :  { %240 = vrot.lane.b32.xlu0 %v1238_v54, %s1371_s2 }
 0x1f0   :  { %v1240_v55 = vpop.eup %1239 }
 0x1f1   :  { %238 = vrot.lane.b32.xlu1 %v1240_v55, %s1371_s2  ;;  %v373_v55 = vld [vmem:[#allocation2 + $0xa] sm:$0x1] }
 0x25f   :  { %v241_v56 = vpop.permute.xlu0 %240 }
 0x260   :  { %v1494_v57 = vmul.f32 %v241_v56, %v203_v39 }
 0x262   :  { %v260_v58 = vpack.c.bf16 %v1494_v57, %v1494_v57 }
 0x263   :  { %v239_v59 = vpop.permute.xlu1 %238 }
 0x264   :  { %v264_v60 = vunpack.c.l.b16 %v260_v58  ;;  %v1498_v61 = vmul.f32 %v239_v59, %v202_v41 }
 0x266   :  { %v259_v62 = vpack.c.bf16 %v1498_v61, %v1498_v61  ;;  %v265_v63 = vrot.slane %v264_v60, 7 }
 0x268   :  { %v263_v0 = vunpack.c.l.b16 %v259_v62 }
 0x26a   :  { %v267_v1 = vsel %vm266_vm8, %v265_v63, %v263_v0 }
 0x26b   :  { %v268_v2 = vpack.c.b16 %v267_v1, %v267_v1 }
 0x26d   :  { %269 = vrot.lane.b32.xlu0 %v268_v2, %s1369_s3 }
 0x2df   :  { %v270_v3 = vpop.permute.xlu0 %269 }
 0x2e0   :  { %1171 = vmatmul.mubr.msk.bf16.vlgmr.msra.gmra.mrb[4].mxu0 %vm146_vm4, %v270_v3 }
 0x2e1   :  { %1183 = vmatpush3.bf16.msra.mxu0 %v1433_v7  ;;  %1186 = vmatprep.mubr.msk.bf16.mxu0 %vm1368_vm3, %v1367_v6 }
 0x2e2   :  { %1184 = vmatprep.subr.bf16.mxu0 %v1367_v6 }
 0x2e5   :  { %1185 = vmatpush3.bf16.msra.mxu0 %v1446_v9 }
 0x2e6   :  { %1198 = vmatprep.subr.bf16.mxu0 %v1367_v6 }
 0x3b3   :  { %v308_v5 = vpop.f32.mrb[4].mxu0 }
 0x3b4   :  { %v315_v8 = vrot.slane %v308_v5, 1  ;;  %v318_v10 = vadd.f32 %v308_v5, %v257_v4  ;;  %v1172_v11 = vpop.f32.mrb[5].mxu0 }
 0x3b5   :  { %v311_v13 = vpop.f32.mrb[6].mxu0 }
 0x3b6   :  { %v319_v14 = vadd.f32 %v315_v8, %v258_v12  ;;  %v320_v15 = vmul.f32 %v318_v10, %v1476_v27  ;;  %v1173_v16 = vpop.f32.mrb[7].mxu0 }
 0x3b8   :  { %v321_v17 = vmul.f32 %v319_v14, %v1476_v27  ;;  %1241 = vtanh.f32 %v320_v15 }
 0x3ba   :  { %1243 = vtanh.f32 %v321_v17 }
 0x3c2   :  { %v1242_v18 = vpop.eup %1241 }
 0x3c3   :  { %v324_v19 = vmul.f32 %v1242_v18, %v1476_v27 }
 0x3c4   :  { %v1244_v20 = vpop.eup %1243 }
 0x3c5   :  { %v326_v21 = vadd.f32 %v324_v19, %v1482_v37  ;;  %v325_v22 = vmul.f32 %v1244_v20, %v1476_v27 }
 0x3c7   :  { %332 = vrot.lane.b32.xlu0 %v326_v21, %s1371_s2  ;;  %v327_v23 = vadd.f32 %v325_v22, %v1482_v37  ;;  %v328_v29 = vmul.f32 %v326_v21, %v232_v53 }
 0x3c9   :  { %334 = vrot.lane.b32.xlu1 %v327_v23, %s1371_s2  ;;  %v329_v32 = vmul.f32 %v327_v23, %v233_v50  ;;  %v372_v50 = vld [vmem:[#allocation2 + $0x2] sm:$0x1] }
 0x439   :  { %v333_v24 = vpop.permute.xlu0 %332 }
 0x43a   :  { %v338_v25 = vmul.f32 %v333_v24, %v326_v21 }
 0x43b   :  { %v335_v26 = vpop.permute.xlu1 %334 }
 0x43c   :  { %v339_v28 = vmul.f32 %v335_v26, %v327_v23  ;;  %342 = vrot.lane.b32.xlu0 %v338_v25, %s1369_s3 }
 0x43e   :  { %344 = vrot.lane.b32.xlu1 %v339_v28, %s1369_s3 }
 0x4ae   :  { %v343_v30 = vpop.permute.xlu0 %342 }
 0x4af   :  { %v348_v31 = vadd.f32 %v343_v30, %v328_v29 }
 0x4b0   :  { %v345_v33 = vpop.permute.xlu1 %344 }
 0x4b1   :  { %1245 = vtanh.f32 %v348_v31  ;;  %v349_v34 = vadd.f32 %v345_v33, %v329_v32  ;;  %v486_v33 = vld [vmem:[#allocation2 + $0x3] sm:$0x1] }
 0x4b3   :  { %1247 = vtanh.f32 %v349_v34 }
 0x4bb   :  { %v1246_v35 = vpop.eup %1245 }
 0x4bc   :  { %354 = vrot.lane.b32.xlu0 %v1246_v35, %s1371_s2 }
 0x4bd   :  { %v1248_v36 = vpop.eup %1247 }
 0x4be   :  { %356 = vrot.lane.b32.xlu1 %v1248_v36, %s1371_s2 }
 0x52e   :  { %v355_v38 = vpop.permute.xlu0 %354 }
 0x52f   :  { %v1523_v39 = vmul.f32 %v355_v38, %v326_v21 }
 0x530   :  { %v357_v40 = vpop.permute.xlu1 %356 }
 0x531   :  { %v1525_v41 = vmul.f32 %v357_v40, %v327_v23  ;;  %v374_v42 = vpack.c.bf16 %v1523_v39, %v1523_v39  ;;  %v487_v40 = vld [vmem:[#allocation2 + $0xb] sm:$0x1] }
 0x533   :  { %v375_v43 = vpack.c.bf16 %v1525_v41, %v1525_v41  ;;  %v378_v45 = vunpack.c.l.b16 %v374_v42 }
 0x535   :  { %v379_v44 = vunpack.c.l.b16 %v375_v43 }
 0x537   :  { %v380_v46 = vrot.slane %v379_v44, 7 }
 0x539   :  { %v381_v47 = vsel %vm266_vm8, %v380_v46, %v378_v45 }
 0x53a   :  { %v382_v48 = vpack.c.b16 %v381_v47, %v381_v47 }
 0x53c   :  { %383 = vrot.lane.b32.xlu1 %v382_v48, %s1369_s3 }
 0x5ae   :  { %v384_v49 = vpop.permute.xlu1 %383 }
 0x5af   :  { %1179 = vmatmul.mubr.msk.bf16.vlgmr.msra.gmra.mrb[4].mxu1 %vm146_vm4, %v384_v49 }
 0x5b0   :  { %1191 = vmatpush3.bf16.msra.mxu1 %v1433_v7  ;;  %1194 = vmatprep.mubr.msk.bf16.mxu1 %vm1368_vm3, %v1367_v6 }
 0x5b1   :  { %1192 = vmatprep.subr.bf16.mxu1 %v1367_v6 }
 0x5b4   :  { %1193 = vmatpush3.bf16.msra.mxu1 %v1446_v9 }
 0x5b5   :  { %1206 = vmatprep.subr.bf16.mxu1 %v1367_v6 }
 0x682   :  { %v422_v51 = vpop.f32.mrb[4].mxu1 }
 0x683   :  { %v429_v52 = vrot.slane %v422_v51, 1  ;;  %v432_v53 = vadd.f32 %v422_v51, %v372_v50  ;;  %v1180_v54 = vpop.f32.mrb[5].mxu1 }
 0x684   :  { %v425_v56 = vpop.f32.mrb[6].mxu1 }
 0x685   :  { %v433_v58 = vadd.f32 %v429_v52, %v373_v55  ;;  %v434_v59 = vmul.f32 %v432_v53, %v1476_v27  ;;  %v1181_v60 = vpop.f32.mrb[7].mxu1 }
 0x687   :  { %v435_v62 = vmul.f32 %v433_v58, %v1476_v27  ;;  %1249 = vtanh.f32 %v434_v59 }
 0x689   :  { %1251 = vtanh.f32 %v435_v62 }
 0x691   :  { %v1250_v63 = vpop.eup %1249 }
 0x692   :  { %v438_v0 = vmul.f32 %v1250_v63, %v1476_v27 }
 0x693   :  { %v1252_v1 = vpop.eup %1251 }
 0x694   :  { %v440_v2 = vadd.f32 %v438_v0, %v1482_v37  ;;  %v439_v3 = vmul.f32 %v1252_v1, %v1476_v27 }
 0x696   :  { %446 = vrot.lane.b32.xlu1 %v440_v2, %s1371_s2  ;;  %v441_v4 = vadd.f32 %v439_v3, %v1482_v37  ;;  %v442_v12 = vmul.f32 %v440_v2, %v348_v31 }
 0x698   :  { %448 = vrot.lane.b32.xlu0 %v441_v4, %s1371_s2  ;;  %v443_v15 = vmul.f32 %v441_v4, %v349_v34 }
 0x708   :  { %v447_v5 = vpop.permute.xlu1 %446 }
 0x709   :  { %v452_v8 = vmul.f32 %v447_v5, %v440_v2 }
 0x70a   :  { %v449_v10 = vpop.permute.xlu0 %448 }
 0x70b   :  { %v453_v11 = vmul.f32 %v449_v10, %v441_v4  ;;  %456 = vrot.lane.b32.xlu1 %v452_v8, %s1369_s3 }
 0x70d   :  { %458 = vrot.lane.b32.xlu0 %v453_v11, %s1369_s3 }
 0x77d   :  { %v457_v13 = vpop.permute.xlu1 %456 }
 0x77e   :  { %v462_v14 = vadd.f32 %v457_v13, %v442_v12 }
 0x77f   :  { %v459_v16 = vpop.permute.xlu0 %458 }
 0x780   :  { %1253 = vtanh.f32 %v462_v14  ;;  %v463_v17 = vadd.f32 %v459_v16, %v443_v15 }
 0x782   :  { %1255 = vtanh.f32 %v463_v17 }
 0x78a   :  { %v1254_v18 = vpop.eup %1253 }
 0x78b   :  { %468 = vrot.lane.b32.xlu1 %v1254_v18, %s1371_s2  ;;  %v600_v18 = vld [vmem:[#allocation2 + $0x4] sm:$0x1] }
 0x78c   :  { %v1256_v19 = vpop.eup %1255 }
 0x78d   :  { %470 = vrot.lane.b32.xlu0 %v1256_v19, %s1371_s2 }
 0x7fd   :  { %v469_v20 = vpop.permute.xlu1 %468 }
 0x7fe   :  { %v1552_v21 = vmul.f32 %v469_v20, %v440_v2 }
 0x7ff   :  { %v471_v22 = vpop.permute.xlu0 %470 }
 0x800   :  { %v1554_v23 = vmul.f32 %v471_v22, %v441_v4  ;;  %v488_v24 = vpack.c.bf16 %v1552_v21, %v1552_v21 }
 0x802   :  { %v489_v25 = vpack.c.bf16 %v1554_v23, %v1554_v23  ;;  %v492_v28 = vunpack.c.l.b16 %v488_v24 }
 0x804   :  { %v493_v26 = vunpack.c.l.b16 %v489_v25  ;;  %v601_v25 = vld [vmem:[#allocation2 + $0xc] sm:$0x1] }
 0x806   :  { %v494_v29 = vrot.slane %v493_v26, 7 }
 0x808   :  { %v495_v30 = vsel %vm266_vm8, %v494_v29, %v492_v28 }
 0x809   :  { %v496_v31 = vpack.c.b16 %v495_v30, %v495_v30 }
 0x80b   :  { %497 = vrot.lane.b32.xlu0 %v496_v31, %s1369_s3 }
 0x87d   :  { %v498_v32 = vpop.permute.xlu0 %497 }
 0x87e   :  { %1187 = vmatmul.mubr.msk.bf16.vlgmr.msra.gmra.mrb[8].mxu0 %vm146_vm4, %v498_v32 }
 0x87f   :  { %1199 = vmatpush3.bf16.msra.mxu0 %v1433_v7  ;;  %1202 = vmatprep.mubr.msk.bf16.mxu0 %vm1368_vm3, %v1367_v6 }
 0x880   :  { %1200 = vmatprep.subr.bf16.mxu0 %v1367_v6 }
 0x883   :  { %1201 = vmatpush3.bf16.msra.mxu0 %v1446_v9 }
 0x884   :  { %1214 = vmatprep.subr.bf16.mxu0 %v1367_v6 }
 0x951   :  { %v536_v34 = vpop.f32.mrb[8].mxu0 }
 0x952   :  { %v543_v35 = vrot.slane %v536_v34, 1  ;;  %v546_v36 = vadd.f32 %v536_v34, %v486_v33  ;;  %v1188_v38 = vpop.f32.mrb[9].mxu0 }
 0x953   :  { %v539_v42 = vpop.f32.mrb[10].mxu0 }
 0x954   :  { %v547_v43 = vadd.f32 %v543_v35, %v487_v40  ;;  %v548_v44 = vmul.f32 %v546_v36, %v1476_v27  ;;  %v1189_v45 = vpop.f32.mrb[11].mxu0 }
 0x956   :  { %v549_v46 = vmul.f32 %v547_v43, %v1476_v27  ;;  %1257 = vtanh.f32 %v548_v44 }
 0x958   :  { %1259 = vtanh.f32 %v549_v46 }
 0x960   :  { %v1258_v47 = vpop.eup %1257 }
 0x961   :  { %v552_v48 = vmul.f32 %v1258_v47, %v1476_v27 }
 0x962   :  { %v1260_v49 = vpop.eup %1259 }
 0x963   :  { %v554_v50 = vadd.f32 %v552_v48, %v1482_v37  ;;  %v553_v51 = vmul.f32 %v1260_v49, %v1476_v27 }
 0x965   :  { %560 = vrot.lane.b32.xlu0 %v554_v50, %s1371_s2  ;;  %v555_v52 = vadd.f32 %v553_v51, %v1482_v37  ;;  %v556_v58 = vmul.f32 %v554_v50, %v462_v14 }
 0x967   :  { %562 = vrot.lane.b32.xlu1 %v555_v52, %s1371_s2  ;;  %v557_v62 = vmul.f32 %v555_v52, %v463_v17 }
 0x9d7   :  { %v561_v53 = vpop.permute.xlu0 %560 }
 0x9d8   :  { %v566_v54 = vmul.f32 %v561_v53, %v554_v50 }
 0x9d9   :  { %v563_v55 = vpop.permute.xlu1 %562 }
 0x9da   :  { %v567_v56 = vmul.f32 %v563_v55, %v555_v52  ;;  %570 = vrot.lane.b32.xlu0 %v566_v54, %s1369_s3 }
 0x9dc   :  { %572 = vrot.lane.b32.xlu1 %v567_v56, %s1369_s3 }
 0xa4c   :  { %v571_v59 = vpop.permute.xlu0 %570 }
 0xa4d   :  { %v576_v60 = vadd.f32 %v571_v59, %v556_v58 }
 0xa4e   :  { %v573_v63 = vpop.permute.xlu1 %572 }
 0xa4f   :  { %1261 = vtanh.f32 %v576_v60  ;;  %v577_v0 = vadd.f32 %v573_v63, %v557_v62 }
 0xa51   :  { %1263 = vtanh.f32 %v577_v0 }
 0xa59   :  { %v1262_v1 = vpop.eup %1261 }
 0xa5a   :  { %582 = vrot.lane.b32.xlu0 %v1262_v1, %s1371_s2 }
 0xa5b   :  { %v1264_v2 = vpop.eup %1263 }
 0xa5c   :  { %584 = vrot.lane.b32.xlu1 %v1264_v2, %s1371_s2 }
 0xacc   :  { %v583_v3 = vpop.permute.xlu0 %582 }
 0xacd   :  { %v1581_v4 = vmul.f32 %v583_v3, %v554_v50  ;;  %v714_v3 = vld [vmem:[#allocation2 + $0x5] sm:$0x1] }
 0xace   :  { %v585_v5 = vpop.permute.xlu1 %584 }
 0xacf   :  { %v1583_v8 = vmul.f32 %v585_v5, %v555_v52  ;;  %v602_v10 = vpack.c.bf16 %v1581_v4, %v1581_v4 }
 0xad1   :  { %v603_v11 = vpack.c.bf16 %v1583_v8, %v1583_v8  ;;  %v606_v13 = vunpack.c.l.b16 %v602_v10 }
 0xad3   :  { %v607_v12 = vunpack.c.l.b16 %v603_v11 }
 0xad5   :  { %v608_v14 = vrot.slane %v607_v12, 7 }
 0xad7   :  { %v609_v15 = vsel %vm266_vm8, %v608_v14, %v606_v13  ;;  %v715_v13 = vld [vmem:[#allocation2 + $0xd] sm:$0x1] }
 0xad8   :  { %v610_v16 = vpack.c.b16 %v609_v15, %v609_v15 }
 0xada   :  { %611 = vrot.lane.b32.xlu1 %v610_v16, %s1369_s3 }
 0xb4c   :  { %v612_v17 = vpop.permute.xlu1 %611 }
 0xb4d   :  { %1195 = vmatmul.mubr.msk.bf16.vlgmr.msra.gmra.mrb[8].mxu1 %vm146_vm4, %v612_v17 }
 0xb4e   :  { %1207 = vmatpush3.bf16.msra.mxu1 %v1433_v7  ;;  %1210 = vmatprep.mubr.msk.bf16.mxu1 %vm1368_vm3, %v1367_v6 }
 0xb4f   :  { %1208 = vmatprep.subr.bf16.mxu1 %v1367_v6 }
 0xb52   :  { %1209 = vmatpush3.bf16.msra.mxu1 %v1446_v9 }
 0xc20   :  { %v650_v19 = vpop.f32.mrb[8].mxu1 }
 0xc21   :  { %v657_v20 = vrot.slane %v650_v19, 1  ;;  %v660_v22 = vadd.f32 %v650_v19, %v600_v18  ;;  %v1196_v24 = vpop.f32.mrb[9].mxu1 }
 0xc22   :  { %v653_v26 = vpop.f32.mrb[10].mxu1 }
 0xc23   :  { %v661_v28 = vadd.f32 %v657_v20, %v601_v25  ;;  %v662_v29 = vmul.f32 %v660_v22, %v1476_v27  ;;  %v1197_v30 = vpop.f32.mrb[11].mxu1 }
 0xc25   :  { %v663_v31 = vmul.f32 %v661_v28, %v1476_v27  ;;  %1265 = vtanh.f32 %v662_v29 }
 0xc27   :  { %1267 = vtanh.f32 %v663_v31 }
 0xc2f   :  { %v1266_v32 = vpop.eup %1265 }
 0xc30   :  { %v666_v33 = vmul.f32 %v1266_v32, %v1476_v27 }
 0xc31   :  { %v1268_v34 = vpop.eup %1267 }
 0xc32   :  { %v668_v35 = vadd.f32 %v666_v33, %v1482_v37  ;;  %v667_v36 = vmul.f32 %v1268_v34, %v1476_v27 }
 0xc34   :  { %674 = vrot.lane.b32.xlu1 %v668_v35, %s1371_s2  ;;  %v669_v38 = vadd.f32 %v667_v36, %v1482_v37  ;;  %v670_v45 = vmul.f32 %v668_v35, %v576_v60 }
 0xc36   :  { %676 = vrot.lane.b32.xlu0 %v669_v38, %s1371_s2  ;;  %v671_v48 = vmul.f32 %v669_v38, %v577_v0 }
 0xca6   :  { %v675_v40 = vpop.permute.xlu1 %674 }
 0xca7   :  { %v680_v42 = vmul.f32 %v675_v40, %v668_v35 }
 0xca8   :  { %v677_v43 = vpop.permute.xlu0 %676 }
 0xca9   :  { %v681_v44 = vmul.f32 %v677_v43, %v669_v38  ;;  %684 = vrot.lane.b32.xlu1 %v680_v42, %s1369_s3 }
 0xcab   :  { %686 = vrot.lane.b32.xlu0 %v681_v44, %s1369_s3 }
 0xd1b   :  { %v685_v46 = vpop.permute.xlu1 %684 }
 0xd1c   :  { %v690_v47 = vadd.f32 %v685_v46, %v670_v45 }
 0xd1d   :  { %v687_v49 = vpop.permute.xlu0 %686 }
 0xd1e   :  { %1269 = vtanh.f32 %v690_v47  ;;  %v691_v50 = vadd.f32 %v687_v49, %v671_v48 }
 0xd20   :  { %1271 = vtanh.f32 %v691_v50 }
 0xd28   :  { %v1270_v51 = vpop.eup %1269 }
 0xd29   :  { %696 = vrot.lane.b32.xlu1 %v1270_v51, %s1371_s2 }
 0xd2a   :  { %v1272_v52 = vpop.eup %1271 }
 0xd2b   :  { %698 = vrot.lane.b32.xlu0 %v1272_v52, %s1371_s2  ;;  %v828_v52 = vld [vmem:[#allocation2 + $0x6] sm:$0x1] }
 0xd9b   :  { %v697_v53 = vpop.permute.xlu1 %696 }
 0xd9c   :  { %v1609_v54 = vmul.f32 %v697_v53, %v668_v35 }
 0xd9d   :  { %v699_v55 = vpop.permute.xlu0 %698 }
 0xd9e   :  { %v1611_v56 = vmul.f32 %v699_v55, %v669_v38  ;;  %v716_v58 = vpack.c.bf16 %v1609_v54, %v1609_v54 }
 0xda0   :  { %v717_v59 = vpack.c.bf16 %v1611_v56, %v1611_v56  ;;  %v720_v62 = vunpack.c.l.b16 %v716_v58 }
 0xda2   :  { %v721_v60 = vunpack.c.l.b16 %v717_v59 }
 0xda4   :  { %v722_v63 = vrot.slane %v721_v60, 7  ;;  %v829_v60 = vld [vmem:[#allocation2 + $0xe] sm:$0x1] }
 0xda6   :  { %v723_v0 = vsel %vm266_vm8, %v722_v63, %v720_v62 }
 0xda7   :  { %v724_v1 = vpack.c.b16 %v723_v0, %v723_v0 }
 0xda9   :  { %725 = vrot.lane.b32.xlu0 %v724_v1, %s1369_s3 }
 0xe1b   :  { %v726_v2 = vpop.permute.xlu0 %725 }
 0xe1c   :  { %1203 = vmatmul.mubr.msk.bf16.vlgmr.msra.gmra.mrb[12].mxu0 %vm146_vm4, %v726_v2 }
 0xe1d   :  { %1215 = vmatpush3.bf16.msra.mxu0 %v1433_v7  ;;  %1218 = vmatprep.mubr.msk.bf16.mxu0 %vm1368_vm3, %v1367_v6 }
 0xe1e   :  { %1216 = vmatprep.subr.bf16.mxu0 %v1367_v6 }
 0xe21   :  { %1217 = vmatpush3.bf16.msra.mxu0 %v1446_v9 }
 0xeef   :  { %v764_v5 = vpop.f32.mrb[12].mxu0 }
 0xef0   :  { %v771_v10 = vrot.slane %v764_v5, 1  ;;  %v774_v11 = vadd.f32 %v764_v5, %v714_v3  ;;  %v1204_v12 = vpop.f32.mrb[13].mxu0 }
 0xef1   :  { %v767_v14 = vpop.f32.mrb[14].mxu0 }
 0xef2   :  { %v775_v15 = vadd.f32 %v771_v10, %v715_v13  ;;  %v776_v16 = vmul.f32 %v774_v11, %v1476_v27  ;;  %v1205_v17 = vpop.f32.mrb[15].mxu0 }
 0xef4   :  { %v777_v7 = vmul.f32 %v775_v15, %v1476_v27  ;;  %1273 = vtanh.f32 %v776_v16 }
 0xef6   :  { %1275 = vtanh.f32 %v777_v7 }
 0xefe   :  { %v1274_v18 = vpop.eup %1273 }
 0xeff   :  { %v780_v6 = vmul.f32 %v1274_v18, %v1476_v27 }
 0xf00   :  { %v1276_v19 = vpop.eup %1275 }
 0xf01   :  { %v782_v9 = vadd.f32 %v780_v6, %v1482_v37  ;;  %v781_v20 = vmul.f32 %v1276_v19, %v1476_v27 }
 0xf03   :  { %788 = vrot.lane.b32.xlu0 %v782_v9, %s1371_s2  ;;  %v783_v22 = vadd.f32 %v781_v20, %v1482_v37  ;;  %v784_v29 = vmul.f32 %v782_v9, %v690_v47 }
 0xf05   :  { %790 = vrot.lane.b32.xlu1 %v783_v22, %s1371_s2  ;;  %v785_v32 = vmul.f32 %v783_v22, %v691_v50 }
 0xf75   :  { %v789_v24 = vpop.permute.xlu0 %788 }
 0xf76   :  { %v794_v25 = vmul.f32 %v789_v24, %v782_v9 }
 0xf77   :  { %v791_v26 = vpop.permute.xlu1 %790 }
 0xf78   :  { %v795_v28 = vmul.f32 %v791_v26, %v783_v22  ;;  %798 = vrot.lane.b32.xlu0 %v794_v25, %s1369_s3 }
 0xf7a   :  { %800 = vrot.lane.b32.xlu1 %v795_v28, %s1369_s3 }
 0xfea   :  { %v799_v30 = vpop.permute.xlu0 %798 }
 0xfeb   :  { %v804_v31 = vadd.f32 %v799_v30, %v784_v29 }
 0xfec   :  { %v801_v33 = vpop.permute.xlu1 %800 }
 0xfed   :  { %1277 = vtanh.f32 %v804_v31  ;;  %v805_v34 = vadd.f32 %v801_v33, %v785_v32 }
 0xfef   :  { %1279 = vtanh.f32 %v805_v34 }
 0xff7   :  { %v1278_v35 = vpop.eup %1277 }
 0xff8   :  { %810 = vrot.lane.b32.xlu0 %v1278_v35, %s1371_s2 }
 0xff9   :  { %v1280_v36 = vpop.eup %1279 }
 0xffa   :  { %812 = vrot.lane.b32.xlu1 %v1280_v36, %s1371_s2 }
0x106a   :  { %v811_v38 = vpop.permute.xlu0 %810 }
0x106b   :  { %v1637_v40 = vmul.f32 %v811_v38, %v782_v9 }
0x106c   :  { %v813_v42 = vpop.permute.xlu1 %812 }
0x106d   :  { %v1639_v43 = vmul.f32 %v813_v42, %v783_v22  ;;  %v830_v44 = vpack.c.bf16 %v1637_v40, %v1637_v40  ;;  %v942_v42 = vld [vmem:[#allocation2 + $0x7] sm:$0x1] }
0x106f   :  { %v831_v45 = vpack.c.bf16 %v1639_v43, %v1639_v43  ;;  %v834_v47 = vunpack.c.l.b16 %v830_v44 }
0x1071   :  { %v835_v46 = vunpack.c.l.b16 %v831_v45 }
0x1073   :  { %v836_v48 = vrot.slane %v835_v46, 7 }
0x1075   :  { %v837_v49 = vsel %vm266_vm8, %v836_v48, %v834_v47  ;;  %v943_v48 = vld [vmem:[#allocation2 + $0xf] sm:$0x1] }
0x1076   :  { %v838_v50 = vpack.c.b16 %v837_v49, %v837_v49 }
0x1078   :  { %839 = vrot.lane.b32.xlu1 %v838_v50, %s1369_s3 }
0x10ea   :  { %v840_v51 = vpop.permute.xlu1 %839 }
0x10eb   :  { %1211 = vmatmul.mubr.msk.bf16.vlgmr.msra.gmra.mrb[12].mxu1 %vm146_vm4, %v840_v51 }
0x11be   :  { %v878_v53 = vpop.f32.mrb[12].mxu1 }
0x11bf   :  { %v885_v55 = vrot.slane %v878_v53, 1  ;;  %v888_v58 = vadd.f32 %v878_v53, %v828_v52  ;;  %v1212_v59 = vpop.f32.mrb[13].mxu1 }
0x11c0   :  { %v881_v62 = vpop.f32.mrb[14].mxu1 }
0x11c1   :  { %v889_v63 = vadd.f32 %v885_v55, %v829_v60  ;;  %v890_v0 = vmul.f32 %v888_v58, %v1476_v27  ;;  %v1213_v1 = vpop.f32.mrb[15].mxu1 }
0x11c3   :  { %v891_v2 = vmul.f32 %v889_v63, %v1476_v27  ;;  %1281 = vtanh.f32 %v890_v0 }
0x11c5   :  { %1283 = vtanh.f32 %v891_v2 }
0x11cd   :  { %v1282_v3 = vpop.eup %1281 }
0x11ce   :  { %v894_v5 = vmul.f32 %v1282_v3, %v1476_v27 }
0x11cf   :  { %v1284_v10 = vpop.eup %1283 }
0x11d0   :  { %v896_v11 = vadd.f32 %v894_v5, %v1482_v37  ;;  %v895_v12 = vmul.f32 %v1284_v10, %v1476_v27 }
0x11d2   :  { %902 = vrot.lane.b32.xlu1 %v896_v11, %s1371_s2  ;;  %v897_v13 = vadd.f32 %v895_v12, %v1482_v37  ;;  %v898_v7 = vmul.f32 %v896_v11, %v804_v31 }
0x11d4   :  { %904 = vrot.lane.b32.xlu0 %v897_v13, %s1371_s2  ;;  %v899_v19 = vmul.f32 %v897_v13, %v805_v34 }
0x1244   :  { %v903_v14 = vpop.permute.xlu1 %902 }
0x1245   :  { %v908_v15 = vmul.f32 %v903_v14, %v896_v11 }
0x1246   :  { %v905_v16 = vpop.permute.xlu0 %904 }
0x1247   :  { %v909_v17 = vmul.f32 %v905_v16, %v897_v13  ;;  %912 = vrot.lane.b32.xlu1 %v908_v15, %s1369_s3 }
0x1249   :  { %914 = vrot.lane.b32.xlu0 %v909_v17, %s1369_s3 }
0x12b9   :  { %v913_v18 = vpop.permute.xlu1 %912 }
0x12ba   :  { %v918_v6 = vadd.f32 %v913_v18, %v898_v7 }
0x12bb   :  { %v915_v9 = vpop.permute.xlu0 %914 }
0x12bc   :  { %1285 = vtanh.f32 %v918_v6  ;;  %v919_v20 = vadd.f32 %v915_v9, %v899_v19 }
0x12be   :  { %1287 = vtanh.f32 %v919_v20 }
0x12c6   :  { %v1286_v22 = vpop.eup %1285 }
0x12c7   :  { %924 = vrot.lane.b32.xlu1 %v1286_v22, %s1371_s2 }
0x12c8   :  { %v1288_v24 = vpop.eup %1287 }
0x12c9   :  { %926 = vrot.lane.b32.xlu0 %v1288_v24, %s1371_s2 }
0x1339   :  { %v925_v25 = vpop.permute.xlu1 %924 }
0x133a   :  { %v1660_v26 = vmul.f32 %v925_v25, %v896_v11 }
0x133b   :  { %v927_v28 = vpop.permute.xlu0 %926 }
0x133c   :  { %v1662_v29 = vmul.f32 %v927_v28, %v897_v13  ;;  %v944_v30 = vpack.c.bf16 %v1660_v26, %v1660_v26 }
0x133e   :  { %v945_v31 = vpack.c.bf16 %v1662_v29, %v1662_v29  ;;  %v948_v33 = vunpack.c.l.b16 %v944_v30 }
0x1340   :  { %v949_v32 = vunpack.c.l.b16 %v945_v31 }
0x1342   :  { %v950_v34 = vrot.slane %v949_v32, 7 }
0x1344   :  { %v951_v35 = vsel %vm266_vm8, %v950_v34, %v948_v33 }
0x1345   :  { %v952_v36 = vpack.c.b16 %v951_v35, %v951_v35 }
0x1347   :  { %953 = vrot.lane.b32.xlu0 %v952_v36, %s1369_s3 }
0x13b9   :  { %v954_v38 = vpop.permute.xlu0 %953 }
0x13ba   :  { %1219 = vmatmul.mubr.msk.bf16.vlgmr.msra.gmra.mrb[16].mxu0 %vm146_vm4, %v954_v38 }
0x148d   :  { %v992_v44 = vpop.f32.mrb[16].mxu0 }
0x148e   :  { %v999_v45 = vrot.slane %v992_v44, 1  ;;  %v1002_v46 = vadd.f32 %v992_v44, %v942_v42  ;;  %v1220_v47 = vpop.f32.mrb[17].mxu0 }
0x148f   :  { %v995_v49 = vpop.f32.mrb[18].mxu0 }
0x1490   :  { %v1003_v50 = vadd.f32 %v999_v45, %v943_v48  ;;  %v1004_v51 = vmul.f32 %v1002_v46, %v1476_v27  ;;  %v1221_v52 = vpop.f32.mrb[19].mxu0 }
0x1492   :  { %v1005_v53 = vmul.f32 %v1003_v50, %v1476_v27  ;;  %1289 = vtanh.f32 %v1004_v51 }
0x1494   :  { %1291 = vtanh.f32 %v1005_v53 }
0x149c   :  { %v1290_v55 = vpop.eup %1289 }
0x149d   :  { %v1008_v58 = vmul.f32 %v1290_v55, %v1476_v27 }
0x149e   :  { %v1292_v59 = vpop.eup %1291 }
0x149f   :  { %v1010_v60 = vadd.f32 %v1008_v58, %v1482_v37  ;;  %v1009_v62 = vmul.f32 %v1292_v59, %v1476_v27 }
0x14a1   :  { %1016 = vrot.lane.b32.xlu0 %v1010_v60, %s1371_s2  ;;  %v1011_v63 = vadd.f32 %v1009_v62, %v1482_v37  ;;  %v1012_v5 = vmul.f32 %v1010_v60, %v918_v6 }
0x14a3   :  { %1018 = vrot.lane.b32.xlu1 %v1011_v63, %s1371_s2  ;;  %v1013_v12 = vmul.f32 %v1011_v63, %v919_v20 }
0x1513   :  { %v1017_v0 = vpop.permute.xlu0 %1016 }
0x1514   :  { %v1022_v1 = vmul.f32 %v1017_v0, %v1010_v60 }
0x1515   :  { %v1019_v2 = vpop.permute.xlu1 %1018 }
0x1516   :  { %v1023_v3 = vmul.f32 %v1019_v2, %v1011_v63  ;;  %1026 = vrot.lane.b32.xlu0 %v1022_v1, %s1369_s3 }
0x1518   :  { %1028 = vrot.lane.b32.xlu1 %v1023_v3, %s1369_s3 }
0x1588   :  { %v1027_v10 = vpop.permute.xlu0 %1026 }
0x1589   :  { %v1032_v11 = vadd.f32 %v1027_v10, %v1012_v5 }
0x158a   :  { %v1029_v13 = vpop.permute.xlu1 %1028 }
0x158b   :  { %1293 = vtanh.f32 %v1032_v11  ;;  %v1033_v27 = vadd.f32 %v1029_v13, %v1013_v12 }
0x158d   :  { %1295 = vtanh.f32 %v1033_v27  ;;  %v1065_v14 = vrot.slane %v1033_v27, 7 }
0x158f   :  { %v1066_v37 = vsel %vm266_vm8, %v1065_v14, %v1032_v11 }
0x1595   :  { %v1294_v15 = vpop.eup %1293 }
0x1596   :  { %1038 = vrot.lane.b32.xlu0 %v1294_v15, %s1371_s2 }
0x1597   :  { %v1296_v16 = vpop.eup %1295 }
0x1598   :  { %1040 = vrot.lane.b32.xlu1 %v1296_v16, %s1371_s2 }
0x159a   :  { %248 = vrot.lane.b32.xlu0 %v1498_v61, %s1369_s3 }
0x159c   :  { %250 = vrot.lane.b32.xlu1 %v1494_v57, %s1369_s3 }
0x159e   :  { %364 = vrot.lane.b32.xlu0 %v1523_v39, %s1369_s3 }
0x15a0   :  { %366 = vrot.lane.b32.xlu1 %v1525_v41, %s1369_s3 }
0x15a2   :  { %478 = vrot.lane.b32.xlu0 %v1552_v21, %s1369_s3 }
0x15a4   :  { %480 = vrot.lane.b32.xlu1 %v1554_v23, %s1369_s3 }
0x15a6   :  { %592 = vrot.lane.b32.xlu0 %v1581_v4, %s1369_s3 }
0x15a8   :  { %594 = vrot.lane.b32.xlu1 %v1583_v8, %s1369_s3 }
0x15aa   :  { %706 = vrot.lane.b32.xlu0 %v1609_v54, %s1369_s3 }
0x15ac   :  { %708 = vrot.lane.b32.xlu1 %v1611_v56, %s1369_s3 }
0x15ae   :  { %820 = vrot.lane.b32.xlu0 %v1637_v40, %s1369_s3 }
0x15b0   :  { %822 = vrot.lane.b32.xlu1 %v1639_v43, %s1369_s3 }
0x15b2   :  { %934 = vrot.lane.b32.xlu0 %v1660_v26, %s1369_s3 }
0x15b4   :  { %936 = vrot.lane.b32.xlu1 %v1662_v29, %s1369_s3 }
0x1608   :  { %v1039_v57 = vpop.permute.xlu0 %1038 }
0x1609   :  { %v1044_v61 = vmul.f32 %v1039_v57, %v1010_v60 }
0x160a   :  { %v1041_v39 = vpop.permute.xlu1 %1040 }
0x160b   :  { %v1045_v41 = vmul.f32 %v1041_v39, %v1011_v63  ;;  %1048 = vrot.lane.b32.xlu0 %v1044_v61, %s1369_s3 }
0x160c   :  { %v249_v21 = vpop.permute.xlu0 %248 }
0x160d   :  { %v1056_v23 = vrot.slane %v1045_v41, 7  ;;  %255 = vst.msk [vmem:[#allocation3] sm:$0x1] %vm254_vm9, %v249_v21 }
0x160e   :  { %v251_v4 = vpop.permute.xlu1 %250 }
0x160f   :  { %256 = vst.msk [vmem:[#allocation3 + $0x8] sm:$0x1] %vm254_vm9, %v251_v4  ;;  %1067 = vrot.lane.b32.xlu0 %v1066_v37, %s1372_s11  ;;  %v1057_v8 = vsel %vm266_vm8, %v1056_v23, %v1044_v61 }
0x1610   :  { %v365_v54 = vpop.permute.xlu0 %364  ;;  %1058 = vrot.lane.b32.xlu1 %v1057_v8, %s1369_s3 }
0x1611   :  { %370 = vst.msk [vmem:[#allocation3 + $0x1] sm:$0x1] %vm254_vm9, %v365_v54 }
0x1612   :  { %v367_v56 = vpop.permute.xlu1 %366 }
0x1613   :  { %371 = vst.msk [vmem:[#allocation3 + $0x9] sm:$0x1] %vm254_vm9, %v367_v56 }
0x1614   :  { %v479_v40 = vpop.permute.xlu0 %478  ;;  %1050 = vrot.lane.b32.xlu1 %v1045_v41, %s1369_s3 }
0x1615   :  { %484 = vst.msk [vmem:[#allocation3 + $0x2] sm:$0x1] %vm254_vm9, %v479_v40 }
0x1616   :  { %v481_v43 = vpop.permute.xlu1 %480 }
0x1617   :  { %485 = vst.msk [vmem:[#allocation3 + $0xa] sm:$0x1] %vm254_vm9, %v481_v43 }
0x1618   :  { %v593_v17 = vpop.permute.xlu0 %592 }
0x1619   :  { %598 = vst.msk [vmem:[#allocation3 + $0x3] sm:$0x1] %vm254_vm9, %v593_v17 }
0x161a   :  { %v595_v7 = vpop.permute.xlu1 %594 }
0x161b   :  { %599 = vst.msk [vmem:[#allocation3 + $0xb] sm:$0x1] %vm254_vm9, %v595_v7 }
0x161c   :  { %v707_v18 = vpop.permute.xlu0 %706 }
0x161d   :  { %712 = vst.msk [vmem:[#allocation3 + $0x4] sm:$0x1] %vm254_vm9, %v707_v18 }
0x161e   :  { %v709_v6 = vpop.permute.xlu1 %708 }
0x161f   :  { %713 = vst.msk [vmem:[#allocation3 + $0xc] sm:$0x1] %vm254_vm9, %v709_v6 }
0x1620   :  { %v821_v19 = vpop.permute.xlu0 %820 }
0x1621   :  { %826 = vst.msk [vmem:[#allocation3 + $0x5] sm:$0x1] %vm254_vm9, %v821_v19 }
0x1622   :  { %v823_v9 = vpop.permute.xlu1 %822 }
0x1623   :  { %827 = vst.msk [vmem:[#allocation3 + $0xd] sm:$0x1] %vm254_vm9, %v823_v9 }
0x1624   :  { %v935_v20 = vpop.permute.xlu0 %934 }
0x1625   :  { %940 = vst.msk [vmem:[#allocation3 + $0x6] sm:$0x1] %vm254_vm9, %v935_v20 }
0x1626   :  { %v937_v22 = vpop.permute.xlu1 %936 }
0x1627   :  { %941 = vst.msk [vmem:[#allocation3 + $0xe] sm:$0x1] %vm254_vm9, %v937_v22 }
0x167d   :  { %v1049_v24 = vpop.permute.xlu0 %1048 }
0x167e   :  { %1054 = vst.msk [vmem:[#allocation3 + $0x7] sm:$0x1] %vm254_vm9, %v1049_v24 }
0x1681   :  { %v1068_v25 = vpop.permute.xlu0 %1067 }
0x1682   :  { %1070 = vst.msk [vmem:[#allocation7] sm:$0x3] %vm27_vm2, %v1068_v25  ;;  %v1059_v26 = vpop.permute.xlu1 %1058 }
0x1683   :  { %1062 = vst.msk [vmem:[#allocation5] sm:$0x3] %vm27_vm2, %v1059_v26 }
0x1684   :  { %1308 = shalt.err (!%p1305_p4)
}
0x1685   :  { %s1309_s21 = scalar_lea.hbm %s1782_s5, 32 }
0x1686   :  { %p1310_p5 = scmp.ne.s32.totalorder %s1782_s5, %s1309_s21  ;;  %p1313_p6 = scmp.lt.u32.totalorder %s1309_s21, %s1782_s5 }
0x1688   :  { %p1315_p7 = pnand %p1313_p6, %p1310_p5 }
0x168a   :  { %1318 = shalt.err (!%p1315_p7)
}
0x168b   :  { %1092 = dma.vmem_to_hbm [thread:$0]  %s1090_s13, 32, %s1782_s5, [#allocation6]  }
0x168c   :  { %s1319_s28 = scalar_lea.vmem %s1100_s17, 32  ;;  %p1324_p9 = scmp.lt.s32.totalorder %s1100_s17, %s1100_s17 }
0x168d   :  { %p1320_p8 = scmp.ne.s32.totalorder %s1100_s17, %s1319_s28  ;;  %p1325_p10 = scmp.lt.s32.totalorder %s1319_s28, %s1319_s28 }
0x168f   :  { %p1326_p11 = por %p1325_p10, %p1324_p9 }
0x1691   :  { %p1327_p12 = pnand %p1326_p11, %p1320_p8 }
0x1693   :  { %1330 = shalt.err (!%p1327_p12)
}
0x1694   :  { %s1331_s1 = scalar_lea.hbm %s1783_s6, 32 }
0x1695   :  { %p1332_p13 = scmp.ne.s32.totalorder %s1783_s6, %s1331_s1  ;;  %p1335_p0 = scmp.lt.u32.totalorder %s1331_s1, %s1783_s6 }
0x1697   :  { %p1337_p1 = pnand %p1335_p0, %p1332_p13 }
0x1699   :  { %1340 = shalt.err (!%p1337_p1)
}
0x169a   :  { %1102 = dma.vmem_to_hbm [thread:$0]  %s1100_s17, 32, %s1783_s6, [#allocation6]   ;;  %v1051_v28 = vpop.permute.xlu1 %1050 }
0x169b   :  { %1055 = vst.msk [vmem:[#allocation3 + $0xf] sm:$0x1] %vm254_vm9, %v1051_v28  ;;  %s1341_s10 = scalar_lea.vmem %s1732_s15, 256  ;;  %p1346_p3 = scmp.lt.s32.totalorder %s1732_s15, %s1732_s15 }
0x169c   :  { %p1342_p2 = scmp.ne.s32.totalorder %s1732_s15, %s1341_s10  ;;  %p1347_p4 = scmp.lt.s32.totalorder %s1341_s10, %s1341_s10 }
0x169e   :  { %p1348_p5 = por %p1347_p4, %p1346_p3 }
0x16a0   :  { %p1349_p6 = pnand %p1348_p5, %p1342_p2 }
0x16a2   :  { %1352 = shalt.err (!%p1349_p6)
}
0x16a3   :  { %s1353_s12 = scalar_lea.hbm %s1781_s4, 256 }
0x16a4   :  { %p1354_p7 = scmp.ne.s32.totalorder %s1781_s4, %s1353_s12  ;;  %p1357_p8 = scmp.lt.u32.totalorder %s1353_s12, %s1781_s4 }
0x16a6   :  { %p1359_p9 = pnand %p1357_p8, %p1354_p7 }
0x16a8   :  { %1362 = shalt.err (!%p1359_p9)
}
0x16a9   :  { %s1376_s17 = smov 128   ;;  %s1377_s18 = smov 8  }
0x16aa   :  { %1082 = dma.vmem_to_hbm [thread:$0]  %s1732_s15, 256, %s1781_s4, [#allocation4], %s1376_s17, %s1376_s17, %s1377_s18  }
0x16ab   :  { %1363 = dma.done.wait [#allocation4], 256  }
0x16ac   :  { %1364 = vsyncadd [#allocation4], 4294967040 }
0x16ad   :  { %1365 = dma.done.wait [#allocation6], 64  }
0x16ae   :  { %1366 = vsyncadd [#allocation6], 4294967232 }
0x16af   :  { %1112 = vsyncpa [#allocation4], 1 }
0x16b0   :  { %1113 = vsyncpa [#allocation6], 1 }

</bundles_post_ra>
